<compile_context>
chip_gen: v7x
topology: tpu7x:2x2x1
jax: 0.10.0
libtpu: 0.0.40
codegen_flags: <defaults>
</compile_context>

<pallas_src>
import functools
import math

import jax
import jax.numpy as jnp
from jax.experimental import pallas as pl
from jax.experimental.pallas import tpu as pltpu

LEAK = 0.2          # LeakyReLU negative slope used by the module
LANE_TARGET = 8192  # target spatial lanes per deconv grid step (row tiling)


def _vmem_limit_bytes():
    cap = 64 * 1024 * 1024  # conservative fallback (v7x-sized)
    try:
        info = pltpu.get_tpu_info()
        cap = int(getattr(info, "vmem_capacity_bytes", cap) or cap)
    except Exception:
        pass
    return int(min(100 * 1024 * 1024, 0.75 * cap))


_VMEM_LIMIT = _vmem_limit_bytes()


# ----------------------------- Pallas kernels --------------------------------

def _linear_kernel(x_ref, w_ref, b_ref, o_ref, *, apply_relu):
    """LinearWN hot path: y = x @ W_eff^T + b (+ optional LeakyReLU(0.2))."""
    y = jnp.dot(x_ref[...], w_ref[...], preferred_element_type=jnp.float32)
    y = y + b_ref[...]
    if apply_relu:
        y = jnp.maximum(y, LEAK * y)
    o_ref[...] = y


def _deconv_kernel(core_ref, halo_ref, w2_ref, tb_ref, o_ref, win_ref, *,
                   cin, th, wdt, apply_relu):
    """One (row-tile, batch) step of ConvTranspose2d(k=4,s=2,p=1)+texel bias.

    core_ref : (Cin, TH*W)        this tile's input rows, spatially flattened.
    halo_ref : (Cin, 2*W)         row above / row below the tile (zeros at the
                                  image border).
    w2_ref   : (8, Cout, 2*Cin)   per (a, b, di) weight slice with the two dj
                                  taps stacked on the contraction axis.
    tb_ref   : (4, Cout, TH*W)    texel bias (+ folded conv bias) per parity.
    o_ref    : (4, Cout, TH*W)    parity-planar output tile.
    win_ref  : (3*Cin,(TH+2)*W)   scratch: column-shifted copies (c=-1,0,+1)
                                  of the tile window incl. the 1-row halo.
    """
    L = (th + 2) * wdt
    cdt = win_ref.dtype

    # centre (un-shifted) window = [row above | core rows | row below]
    win_ref[cin:2 * cin, 0:wdt] = halo_ref[:, 0:wdt]
    win_ref[cin:2 * cin, wdt:(th + 1) * wdt] = core_ref[...]
    win_ref[cin:2 * cin, (th + 1) * wdt:L] = halo_ref[:, wdt:2 * wdt]
    centre = win_ref[cin:2 * cin, :]

    # column-border masks for the +-1 shifts
    lane = jax.lax.broadcasted_iota(jnp.int32, (1, L), 1)
    if wdt & (wdt - 1) == 0:
        col = lane & (wdt - 1)
    else:
        col = lane % wdt
    not_first = col != 0
    not_last = col != (wdt - 1)

    zcol = jnp.zeros((cin, 1), cdt)
    zero = jnp.zeros((), cdt)
    # c = -1 : column n reads original column n-1 (zero at n == 0)
    win_ref[0:cin, :] = jnp.where(
        not_first, jnp.concatenate([zcol, centre[:, :L - 1]], axis=1), zero)
    # c = +1 : column n reads original column n+1 (zero at n == W-1)
    win_ref[2 * cin:3 * cin, :] = jnp.where(
        not_last, jnp.concatenate([centre[:, 1:], zcol], axis=1), zero)

    for a in range(2):          # output row parity
        for b in range(2):      # output column parity
            acc = tb_ref[2 * a + b].astype(jnp.float32)
            for di in range(2):
                off = (a + di) * wdt
                slab = win_ref[b * cin:(b + 2) * cin, off:off + th * wdt]
                acc = acc + jnp.dot(w2_ref[(2 * a + b) * 2 + di], slab,
                                    preferred_element_type=jnp.float32)
            if apply_relu:
                acc = jnp.maximum(acc, LEAK * acc)
            o_ref[2 * a + b] = acc.astype(o_ref.dtype)


# ----------------------------- layer wrappers ---------------------------------

def linear_wn(x, w, g, b, *, apply_relu):
    """LinearWN: y = x @ (w * g[:,None] / ||w||_F).T + b (+ optional LeakyReLU)."""
    wnorm = jnp.sqrt(jnp.sum(w * w))
    w_eff_t = (w * g[:, None] / wnorm).T
    bsz, n_in = x.shape
    n_out = w.shape[0]
    return pl.pallas_call(
        functools.partial(_linear_kernel, apply_relu=apply_relu),
        grid=(1,),
        in_specs=[
            pl.BlockSpec((bsz, n_in), lambda i: (0, 0)),
            pl.BlockSpec((n_in, n_out), lambda i: (0, 0)),
            pl.BlockSpec((1, n_out), lambda i: (0, 0)),
        ],
        out_specs=pl.BlockSpec((bsz, n_out), lambda i: (0, 0)),
        out_shape=jax.ShapeDtypeStruct((bsz, n_out), jnp.float32),
        compiler_params=pltpu.CompilerParams(vmem_limit_bytes=_VMEM_LIMIT),
    )(x, w_eff_t, b.reshape(1, n_out))


def paired_linear_wn(x_pair, p_a, p_b, *, apply_relu):
    """Run two same-shaped LinearWN heads (local / outsource) in one pallas_call."""
    def eff(p):
        w, g, b = p["w"], p["g"], p["b"]
        return (w * g[:, None] / jnp.sqrt(jnp.sum(w * w))).T, b

    wa, ba = eff(p_a)
    wb, bb = eff(p_b)
    x = jnp.stack(x_pair, axis=0)                    # (2, B, n_in)
    wt = jnp.stack([wa, wb], axis=0)                 # (2, n_in, n_out)
    bt = jnp.stack([ba, bb], axis=0)[:, None, :]     # (2, 1, n_out)
    _, bsz, n_in = x.shape
    n_out = wt.shape[-1]
    out = pl.pallas_call(
        functools.partial(_linear_kernel, apply_relu=apply_relu),
        grid=(2,),
        in_specs=[
            pl.BlockSpec((None, bsz, n_in), lambda h: (h, 0, 0)),
            pl.BlockSpec((None, n_in, n_out), lambda h: (h, 0, 0)),
            pl.BlockSpec((None, 1, n_out), lambda h: (h, 0, 0)),
        ],
        out_specs=pl.BlockSpec((None, bsz, n_out), lambda h: (h, 0, 0)),
        out_shape=jax.ShapeDtypeStruct((2, bsz, n_out), jnp.float32),
        compiler_params=pltpu.CompilerParams(
            dimension_semantics=("parallel",),
            vmem_limit_bytes=_VMEM_LIMIT),
    )(x, wt, bt)
    return out[0], out[1]


def deconv_texel(x, w, g, cb, tb, *, apply_relu,
                 compute_dtype=jnp.bfloat16, out_dtype=jnp.bfloat16,
                 rows_per_tile=None):
    """DeconvTexelBias forward: ConvTranspose2dWN(k=4, s=2, p=1) + texel bias.

    x : (B, Cin, H, W) NCHW; w : (Cin, Cout, 4, 4); g : (Cout,); cb : (Cout,);
    tb : (1, Cout, 2H, 2W).  Returns (B, Cout, 2H, 2W) in `out_dtype`.
    """
    bsz, cin, h, wdt = x.shape
    cout = w.shape[1]

    # Weight norm + sub-pixel decomposition.  For output parity (a,b) and row
    # tap di, the two column taps (dj=0 -> column shift b-1, dj=1 -> shift b)
    # are stacked on the contraction axis.
    wnorm = jnp.sqrt(jnp.sum(w * w))
    w_eff = w * (g[None, :, None, None] / wnorm)
    w2 = []
    for a in range(2):
        for b in range(2):
            for di in range(2):
                w2.append(jnp.concatenate(
                    [w_eff[:, :, 3 - a - 2 * di, 3 - b].T,    # dj = 0
                     w_eff[:, :, 3 - a - 2 * di, 1 - b].T],   # dj = 1
                    axis=1))
    w2 = jnp.stack(w2, axis=0).astype(compute_dtype)          # (8, Cout, 2*Cin)

    # Texel bias split per output parity; fold the conv bias in (f32).
    tb_par = (tb.reshape(cout, h, 2, wdt, 2)
                .transpose(2, 4, 0, 1, 3)
                .reshape(4, cout, h * wdt))
    tb_all = (tb_par + cb[None, :, None]).astype(jnp.float32)

    # Row tiling; the 1-row halo per tile is passed as a tiny side array.
    th = rows_per_tile if rows_per_tile is not None else min(
        h, max(1, LANE_TARGET // wdt))
    th = max(1, min(th, h))
    while h % th:
        th -= 1
    n_t = h // th
    hw_t = th * wdt

    xc = x.astype(compute_dtype)
    core = xc.reshape(bsz, cin, h * wdt)
    zrow = jnp.zeros((bsz, cin, 1, wdt), compute_dtype)
    tops = jnp.concatenate([zrow, xc[:, :, th - 1::th, :][:, :, :-1, :]], axis=2)
    bots = jnp.concatenate([xc[:, :, ::th, :][:, :, 1:, :], zrow], axis=2)
    halo = (jnp.concatenate([tops, bots], axis=3)          # (B, Cin, n_t, 2W)
               .transpose(0, 2, 1, 3)                      # (B, n_t, Cin, 2W)
               .reshape(bsz * n_t, cin, 2 * wdt))

    out4 = pl.pallas_call(
        functools.partial(_deconv_kernel, cin=cin, th=th, wdt=wdt,
                          apply_relu=apply_relu),
        grid=(n_t, bsz),
        in_specs=[
            pl.BlockSpec((None, cin, hw_t), lambda ti, bi: (bi, 0, ti)),
            pl.BlockSpec((None, cin, 2 * wdt),
                         lambda ti, bi: (bi * n_t + ti, 0, 0)),
            pl.BlockSpec((8, cout, 2 * cin), lambda ti, bi: (0, 0, 0)),
            pl.BlockSpec((4, cout, hw_t), lambda ti, bi: (0, 0, ti)),
        ],
        out_specs=pl.BlockSpec((None, 4, cout, hw_t),
                               lambda ti, bi: (bi, 0, 0, ti)),
        out_shape=jax.ShapeDtypeStruct((bsz, 4, cout, h * wdt), out_dtype),
        scratch_shapes=[pltpu.VMEM((3 * cin, (th + 2) * wdt), compute_dtype)],
        compiler_params=pltpu.CompilerParams(
            dimension_semantics=("parallel", "parallel"),
            vmem_limit_bytes=_VMEM_LIMIT),
    )(core, halo, w2, tb_all)

    # parity-planar (B, 4, Cout, H*W) -> NCHW (B, Cout, 2H, 2W)
    out = (out4.reshape(bsz, 2, 2, cout, h, wdt)
               .transpose(0, 3, 4, 1, 5, 2)
               .reshape(bsz, cout, 2 * h, 2 * wdt))
    return out


# ----------------------------- model (forward) --------------------------------

def conv_upsample_fwd(p, x, *, no_activ=False, final=False):
    h = deconv_texel(x, p["conv1"]["w"], p["conv1"]["g"], p["conv1"]["cb"],
                     p["conv1"]["tb"], apply_relu=True, out_dtype=jnp.bfloat16)
    h = deconv_texel(h, p["conv2"]["w"], p["conv2"]["g"], p["conv2"]["cb"],
                     p["conv2"]["tb"], apply_relu=not no_activ,
                     out_dtype=jnp.float32 if final else jnp.bfloat16)
    return h


def texture_decoder_fwd(p, x, z_dim):
    bsz, n = x.shape
    hh = int(math.isqrt(n // z_dim))
    h = x.reshape(bsz, z_dim, hh, hh)
    h = conv_upsample_fwd(p["cu1"], h)
    h = conv_upsample_fwd(p["cu2"], h)
    h = conv_upsample_fwd(p["cu3"], h)
    return h


def forward(params, z_local, z_outsource, v, *, z_dim):
    view_code = linear_wn(v, **params["view_fc"], apply_relu=True)
    z_code, z_code_o = paired_linear_wn(
        (z_local, z_outsource), params["z_fc"], params["z_fc_outsource"],
        apply_relu=True)
    mesh = linear_wn(z_code, **params["mesh_fc"], apply_relu=False)

    feat = jnp.concatenate([view_code, z_code], axis=1)
    feat_o = jnp.concatenate([view_code, z_code_o], axis=1)
    texture_code, texture_code_o = paired_linear_wn(
        (feat, feat_o), params["texture_fc"], params["texture_fc_outsource"],
        apply_relu=True)

    texture_local = texture_decoder_fwd(params["dec_local"], texture_code, z_dim)
    texture_outsource = texture_decoder_fwd(params["dec_outsource"],
                                            texture_code_o, z_dim)
    texture_merge = jnp.concatenate([texture_local, texture_outsource], axis=1)
    texture = conv_upsample_fwd(params["dec_merge"], texture_merge,
                                no_activ=True, final=True)
    return texture, mesh


# ----------------------------- parameter init ---------------------------------

def _init_linear(key, n_in, n_out, alpha=0.2):
    gain = math.sqrt(2.0 / (1.0 + alpha ** 2))
    std = gain * math.sqrt(2.0 / (n_in + n_out))
    kw, kb = jax.random.split(key)
    w = jax.random.uniform(kw, (n_out, n_in), jnp.float32,
                           -std * math.sqrt(3.0), std * math.sqrt(3.0))
    b = 0.01 * jax.random.normal(kb, (n_out,), jnp.float32)
    g = jnp.full((n_out,), jnp.sqrt(jnp.sum(w * w)))
    return {"w": w, "g": g, "b": b}


def _init_deconv(key, cin, cout, out_hw, alpha=0.2):
    gain = math.sqrt(2.0 / (1.0 + alpha ** 2))
    ksize = 4 * 4 // 4
    std = gain * math.sqrt(2.0 / ((cin + cout) * ksize))
    kw, kb, kt = jax.random.split(key, 3)
    w = jax.random.uniform(kw, (cin, cout, 4, 4), jnp.float32,
                           -std * math.sqrt(3.0), std * math.sqrt(3.0))
    cb = 0.01 * jax.random.normal(kb, (cout,), jnp.float32)
    tb = 0.01 * jax.random.normal(kt, (1, cout, out_hw, out_hw), jnp.float32)
    g = jnp.full((cout,), jnp.sqrt(jnp.sum(w * w)))
    return {"w": w, "g": g, "cb": cb, "tb": tb}


def _init_conv_upsample(key, cin, chidden, cout, feature_size, last_alpha=0.2):
    k1, k2 = jax.random.split(key)
    return {"conv1": _init_deconv(k1, cin, chidden, feature_size * 2),
            "conv2": _init_deconv(k2, chidden, cout, feature_size * 4,
                                  alpha=last_alpha)}


def _init_texture_decoder(key, z_dim, base, channel_ratio):
    c1 = int(64 / 16 * channel_ratio)
    c2 = int(32 / 16 * channel_ratio)
    c3 = int(16 / 16 * channel_ratio)
    k1, k2, k3 = jax.random.split(key, 3)
    return {"cu1": _init_conv_upsample(k1, z_dim, z_dim, c1, base),
            "cu2": _init_conv_upsample(k2, c1, c1, c2, base * 4),
            "cu3": _init_conv_upsample(k3, c2, c2, c3, base * 16,
                                       last_alpha=1.0)}


def init_model(key, tex_size, mesh_size, z_dim, local_cr=12, out_cr=4):
    nhidden = z_dim * 4 * 4 if tex_size == 1024 else z_dim * 2 * 2
    dec_base = 2 if tex_size == 512 else 4
    merge_base = 2 if z_dim == 512 else 4
    ks = jax.random.split(key, 9)
    return {
        "view_fc": _init_linear(ks[0], 3, 8),
        "z_fc": _init_linear(ks[1], z_dim, 256),
        "z_fc_outsource": _init_linear(ks[2], z_dim, 256),
        "mesh_fc": _init_linear(ks[3], 256, mesh_size, alpha=1.0),
        "texture_fc": _init_linear(ks[4], 256 + 8, nhidden),
        "texture_fc_outsource": _init_linear(ks[5], 256 + 8, nhidden),
        "dec_local": _init_texture_decoder(ks[6], z_dim, dec_base, local_cr),
        "dec_outsource": _init_texture_decoder(ks[7], z_dim, dec_base, out_cr),
        "dec_merge": _init_conv_upsample(ks[8], 16, 16, 3, merge_base * 2 ** 6),
    }


# --------------------- pure-JAX reference (for validation) --------------------

def _ref_linear(x, w, g, b, *, apply_relu):
    w_eff = w * g[:, None] / jnp.sqrt(jnp.sum(w * w))
    y = jnp.dot(x, w_eff.T, precision=jax.lax.Precision.HIGHEST) + b
    return jnp.maximum(y, LEAK * y) if apply_relu else y


def _ref_deconv_texel(x, w, g, cb, tb, *, apply_relu):
    w_eff = w * g[None, :, None, None] / jnp.sqrt(jnp.sum(w * w))
    wf = jnp.flip(w_eff, axis=(2, 3)).transpose(1, 0, 2, 3)       # OIHW
    y = jax.lax.conv_general_dilated(
        x, wf, window_strides=(1, 1), padding=((2, 2), (2, 2)),
        lhs_dilation=(2, 2), dimension_numbers=("NCHW", "OIHW", "NCHW"),
        precision=jax.lax.Precision.HIGHEST)
    y = y + cb[None, :, None, None] + tb
    return jnp.maximum(y, LEAK * y) if apply_relu else y


def _ref_conv_upsample(p, x, *, no_activ=False):
    h = _ref_deconv_texel(x, p["conv1"]["w"], p["conv1"]["g"], p["conv1"]["cb"],
                          p["conv1"]["tb"], apply_relu=True)
    h = _ref_deconv_texel(h, p["conv2"]["w"], p["conv2"]["g"], p["conv2"]["cb"],
                          p["conv2"]["tb"], apply_relu=not no_activ)
    return h


def _ref_texture_decoder(p, x, z_dim):
    bsz, n = x.shape
    hh = int(math.isqrt(n // z_dim))
    h = x.reshape(bsz, z_dim, hh, hh)
    h = _ref_conv_upsample(p["cu1"], h)
    h = _ref_conv_upsample(p["cu2"], h)
    h = _ref_conv_upsample(p["cu3"], h)
    return h


def ref_forward(params, z_local, z_outsource, v, *, z_dim):
    view_code = _ref_linear(v, **params["view_fc"], apply_relu=True)
    z_code = _ref_linear(z_local, **params["z_fc"], apply_relu=True)
    mesh = _ref_linear(z_code, **params["mesh_fc"], apply_relu=False)
    feat = jnp.concatenate([view_code, z_code], axis=1)
    texture_code = _ref_linear(feat, **params["texture_fc"], apply_relu=True)
    texture_local = _ref_texture_decoder(params["dec_local"], texture_code, z_dim)
    z_code_o = _ref_linear(z_outsource, **params["z_fc_outsource"], apply_relu=True)
    feat_o = jnp.concatenate([view_code, z_code_o], axis=1)
    texture_code_o = _ref_linear(feat_o, **params["texture_fc_outsource"],
                                 apply_relu=True)
    texture_out = _ref_texture_decoder(params["dec_outsource"], texture_code_o, z_dim)
    texture_merge = jnp.concatenate([texture_local, texture_out], axis=1)
    texture = _ref_conv_upsample(params["dec_merge"], texture_merge, no_activ=True)
    return texture, mesh


# ----------------------------------- main --------------------------------------

if __name__ == "__main__":
    # Smallest internally-consistent configuration of the PyTorch module:
    # tex_size=512 requires z_dim=512 so that the merge-branch bias shapes match.
    TEX_SIZE = 512
    Z_DIM = 512
    MESH_SIZE = 64
    BATCH = 2

    root = jax.random.PRNGKey(0)
    k_params, k_zl, k_zo, k_v, k_unit = jax.random.split(root, 5)
    params = init_model(k_params, TEX_SIZE, MESH_SIZE, Z_DIM)

    z_local = jax.random.normal(k_zl, (BATCH, Z_DIM), jnp.float32)
    z_outsource = jax.random.normal(k_zo, (BATCH, Z_DIM), jnp.float32)
    v = jax.random.normal(k_v, (BATCH, 3), jnp.float32)

    def rel_err(a, b):
        a = jnp.asarray(a, jnp.float32)
        b = jnp.asarray(b, jnp.float32)
        return float(jnp.max(jnp.abs(a - b)) / (jnp.max(jnp.abs(b)) + 1e-6))

    uk = jax.random.split(k_unit, 10)

    # Unit check 1: tiled path with halos (f32 compute) -> catches tap/parity/
    # halo/mask indexing bugs with a tight-ish tolerance.
    xu = jax.random.normal(uk[0], (2, 16, 16, 128), jnp.float32)
    wu = 0.1 * jax.random.normal(uk[1], (16, 8, 4, 4), jnp.float32)
    gu = 0.5 + jnp.abs(jax.random.normal(uk[2], (8,), jnp.float32))
    cbu = 0.1 * jax.random.normal(uk[3], (8,), jnp.float32)
    tbu = 0.1 * jax.random.normal(uk[4], (1, 8, 32, 256), jnp.float32)
    yk = deconv_texel(xu, wu, gu, cbu, tbu, apply_relu=True,
                      compute_dtype=jnp.float32, out_dtype=jnp.float32,
                      rows_per_tile=4)
    yr = _ref_deconv_texel(xu, wu, gu, cbu, tbu, apply_relu=True)
    assert yk.shape == (2, 8, 32, 256)
    assert rel_err(yk, yr) < 2e-2, rel_err(yk, yr)

    # Unit check 2: small, lane-unaligned path using the production bf16 dtype.
    xs = jax.random.normal(uk[5], (2, 8, 8, 8), jnp.float32)
    ws = 0.1 * jax.random.normal(uk[6], (8, 5, 4, 4), jnp.float32)
    gs = 0.5 + jnp.abs(jax.random.normal(uk[7], (5,), jnp.float32))
    cbs = 0.1 * jax.random.normal(uk[8], (5,), jnp.float32)
    tbs = 0.1 * jax.random.normal(uk[9], (1, 5, 16, 16), jnp.float32)
    yk2 = deconv_texel(xs, ws, gs, cbs, tbs, apply_relu=True,
                       out_dtype=jnp.float32)
    yr2 = _ref_deconv_texel(xs, ws, gs, cbs, tbs, apply_relu=True)
    assert yk2.shape == (2, 5, 16, 16)
    assert rel_err(yk2, yr2) < 2e-2, rel_err(yk2, yr2)

    # Full model forward (Pallas kernels, bf16 activations inside the decoder).
    fwd = jax.jit(functools.partial(forward, z_dim=Z_DIM))
    texture, mesh = fwd(params, z_local, z_outsource, v)
    jax.block_until_ready((texture, mesh))

    assert texture.shape == (BATCH, 3, TEX_SIZE, TEX_SIZE)
    assert texture.dtype == jnp.float32
    assert mesh.shape == (BATCH, MESH_SIZE)
    assert bool(jnp.all(jnp.isfinite(texture))) and bool(jnp.all(jnp.isfinite(mesh)))

    # End-to-end comparison vs the f32 XLA reference.  The decoder deliberately
    # runs its matmuls / activations in bf16, so this tolerance is loose; the
    # structural (tap / parity / halo) validation happens in the f32 unit check.
    t_ref, m_ref = jax.jit(functools.partial(ref_forward, z_dim=Z_DIM))(
        params, z_local, z_outsource, v)
    assert rel_err(texture, t_ref) < 0.1, rel_err(texture, t_ref)
    assert rel_err(mesh, m_ref) < 2e-2, rel_err(mesh, m_ref)

    print("KERNEL_OK")
</pallas_src>

<mosaic_0001>
module attributes {stable_mosaic.version = 11 : i64} {
  func.func @_deconv_kernel(%arg0: i32, %arg1: i32, %arg2: memref<1x16x512xf32, #tpu.memory_space<vmem>>, %arg3: memref<1x16x256xf32, #tpu.memory_space<vmem>>, %arg4: memref<8x8x32xf32, #tpu.memory_space<vmem>>, %arg5: memref<4x8x512xf32, #tpu.memory_space<vmem>>, %arg6: memref<1x4x8x512xf32, #tpu.memory_space<vmem>>, %arg7: memref<48x768xf32, #tpu.memory_space<vmem>>) attributes {dimension_semantics = [#tpu.dimension_semantics<parallel>, #tpu.dimension_semantics<parallel>], iteration_bounds = array<i64: 4, 2>, scalar_prefetch = 0 : i64, scratch_operands = 1 : i64, tpu.core_type = #tpu.core_type<tc>, window_params = [{transform_indices = @transform_0, window_bounds = array<i64: 1, 16, 512>}, {transform_indices = @transform_1, window_bounds = array<i64: 1, 16, 256>}, {pipeline_mode = #tpu.pipeline_mode<synchronous>, transform_indices = @transform_2, window_bounds = array<i64: 8, 8, 32>}, {transform_indices = @transform_3, window_bounds = array<i64: 4, 8, 512>}, {transform_indices = @transform_4, window_bounds = array<i64: 1, 4, 8, 512>}]} {
    %c0 = arith.constant 0 : index
    %c0_0 = arith.constant 0 : index
    %c0_1 = arith.constant 0 : index
    %0 = vector.load %arg3[%c0, %c0_0, %c0_1] : memref<1x16x256xf32, #tpu.memory_space<vmem>>, vector<1x16x128xf32>
    %1 = vector.shape_cast %0 : vector<1x16x128xf32> to vector<16x128xf32>
    %c16 = arith.constant 16 : index
    %c0_2 = arith.constant 0 : index
    %2 = vector.load %arg7[%c16, %c0_2] : memref<48x768xf32, #tpu.memory_space<vmem>>, vector<16x128xf32>
    tpu.vector_store %arg7[%c16, %c0_2], %1 {strides = array<i32>} : memref<48x768xf32, #tpu.memory_space<vmem>>, vector<16x128xf32>,
    %c0_3 = arith.constant 0 : index
    %c0_4 = arith.constant 0 : index
    %c0_5 = arith.constant 0 : index
    %3 = vector.load %arg2[%c0_3, %c0_4, %c0_5] : memref<1x16x512xf32, #tpu.memory_space<vmem>>, vector<1x16x512xf32>
    %4 = vector.shape_cast %3 : vector<1x16x512xf32> to vector<16x512xf32>
    %c16_6 = arith.constant 16 : index
    %c128 = arith.constant 128 : index
    %5 = vector.load %arg7[%c16_6, %c128] : memref<48x768xf32, #tpu.memory_space<vmem>>, vector<16x512xf32>
    tpu.vector_store %arg7[%c16_6, %c128], %4 {strides = array<i32>} : memref<48x768xf32, #tpu.memory_space<vmem>>, vector<16x512xf32>,
    %c0_7 = arith.constant 0 : index
    %c0_8 = arith.constant 0 : index
    %c128_9 = arith.constant 128 : index
    %6 = vector.load %arg3[%c0_7, %c0_8, %c128_9] : memref<1x16x256xf32, #tpu.memory_space<vmem>>, vector<1x16x128xf32>
    %7 = vector.shape_cast %6 : vector<1x16x128xf32> to vector<16x128xf32>
    %c16_10 = arith.constant 16 : index
    %c640 = arith.constant 640 : index
    %8 = vector.load %arg7[%c16_10, %c640] : memref<48x768xf32, #tpu.memory_space<vmem>>, vector<16x128xf32>
    tpu.vector_store %arg7[%c16_10, %c640], %7 {strides = array<i32>} : memref<48x768xf32, #tpu.memory_space<vmem>>, vector<16x128xf32>,
    %c16_11 = arith.constant 16 : index
    %c0_12 = arith.constant 0 : index
    %9 = vector.load %arg7[%c16_11, %c0_12] : memref<48x768xf32, #tpu.memory_space<vmem>>, vector<16x768xf32>
    %10 = tpu.iota {dimensions = array<i32: 1>} : vector<1x768xi32>
    %c127_i32 = arith.constant 127 : i32
    %11 = vector.broadcast %c127_i32 : i32 to vector<1x768xi32>
    %12 = arith.andi %10, %11 : vector<1x768xi32>
    %c0_i32 = arith.constant 0 : i32
    %13 = vector.broadcast %c0_i32 : i32 to vector<1x768xi32>
    %14 = arith.cmpi ne, %12, %13 : vector<1x768xi32>
    %c127_i32_13 = arith.constant 127 : i32
    %15 = vector.broadcast %c127_i32_13 : i32 to vector<1x768xi32>
    %16 = arith.cmpi ne, %12, %15 : vector<1x768xi32>
    %cst = arith.constant 0.000000e+00 : f32
    %17 = vector.broadcast %cst : f32 to vector<16x1xf32>
    %18 = vector.extract_strided_slice %9 {offsets = [0, 0], sizes = [16, 767], strides = [1, 1]} : vector<16x768xf32> to vector<16x767xf32>
    %19 = tpu.concatenate %17, %18 in 1 : vector<16x1xf32>, vector<16x767xf32> -> vector<16x768xf32>
    %cst_14 = arith.constant 0.000000e+00 : f32
    %20 = vector.shape_cast %14 : vector<1x768xi1> to vector<1x768xi1>
    %21 = vector.broadcast %20 : vector<1x768xi1> to vector<16x768xi1>
    %22 = vector.broadcast %cst_14 : f32 to vector<16x768xf32>
    %23 = arith.select %21, %19, %22 : vector<16x768xi1>, vector<16x768xf32>
    %c0_15 = arith.constant 0 : index
    %c0_16 = arith.constant 0 : index
    %24 = vector.load %arg7[%c0_15, %c0_16] : memref<48x768xf32, #tpu.memory_space<vmem>>, vector<16x768xf32>
    tpu.vector_store %arg7[%c0_15, %c0_16], %23 {strides = array<i32>} : memref<48x768xf32, #tpu.memory_space<vmem>>, vector<16x768xf32>,
    %25 = vector.extract_strided_slice %9 {offsets = [0, 1], sizes = [16, 767], strides = [1, 1]} : vector<16x768xf32> to vector<16x767xf32>
    %26 = tpu.concatenate %25, %17 in 1 : vector<16x767xf32>, vector<16x1xf32> -> vector<16x768xf32>
    %cst_17 = arith.constant 0.000000e+00 : f32
    %27 = vector.shape_cast %16 : vector<1x768xi1> to vector<1x768xi1>
    %28 = vector.broadcast %27 : vector<1x768xi1> to vector<16x768xi1>
    %29 = vector.broadcast %cst_17 : f32 to vector<16x768xf32>
    %30 = arith.select %28, %26, %29 : vector<16x768xi1>, vector<16x768xf32>
    %c32 = arith.constant 32 : index
    %c0_18 = arith.constant 0 : index
    %31 = vector.load %arg7[%c32, %c0_18] : memref<48x768xf32, #tpu.memory_space<vmem>>, vector<16x768xf32>
    tpu.vector_store %arg7[%c32, %c0_18], %30 {strides = array<i32>} : memref<48x768xf32, #tpu.memory_space<vmem>>, vector<16x768xf32>,
    %c0_19 = arith.constant 0 : index
    %c0_20 = arith.constant 0 : index
    %c0_21 = arith.constant 0 : index
    %32 = vector.load %arg5[%c0_19, %c0_20, %c0_21] : memref<4x8x512xf32, #tpu.memory_space<vmem>>, vector<1x8x512xf32>
    %33 = vector.shape_cast %32 : vector<1x8x512xf32> to vector<8x512xf32>
    %c0_22 = arith.constant 0 : index
    %c0_23 = arith.constant 0 : index
    %34 = vector.load %arg7[%c0_22, %c0_23] : memref<48x768xf32, #tpu.memory_space<vmem>>, vector<32x512xf32>
    %c0_24 = arith.constant 0 : index
    %c0_25 = arith.constant 0 : index
    %c0_26 = arith.constant 0 : index
    %35 = vector.load %arg4[%c0_24, %c0_25, %c0_26] : memref<8x8x32xf32, #tpu.memory_space<vmem>>, vector<1x8x32xf32>
    %36 = vector.shape_cast %35 : vector<1x8x32xf32> to vector<8x32xf32>
    %cst_27 = arith.constant dense<0.000000e+00> : vector<8x512xf32>
    %37 = tpu.matmul %36, %34, %cst_27 {dimension_numbers = #tpu.dot_dimension_numbers<[1], [0], [0], [1], [0, 0, 1, 1], [], []>} : vector<8x32xf32>, vector<32x512xf32>, vector<8x512xf32> -> vector<8x512xf32>
    %38 = arith.addf %33, %37 : vector<8x512xf32>
    %c0_28 = arith.constant 0 : index
    %c128_29 = arith.constant 128 : index
    %39 = vector.load %arg7[%c0_28, %c128_29] : memref<48x768xf32, #tpu.memory_space<vmem>>, vector<32x512xf32>
    %c1 = arith.constant 1 : index
    %c0_30 = arith.constant 0 : index
    %c0_31 = arith.constant 0 : index
    %40 = vector.load %arg4[%c1, %c0_30, %c0_31] : memref<8x8x32xf32, #tpu.memory_space<vmem>>, vector<1x8x32xf32>
    %41 = vector.shape_cast %40 : vector<1x8x32xf32> to vector<8x32xf32>
    %cst_32 = arith.constant dense<0.000000e+00> : vector<8x512xf32>
    %42 = tpu.matmul %41, %39, %cst_32 {dimension_numbers = #tpu.dot_dimension_numbers<[1], [0], [0], [1], [0, 0, 1, 1], [], []>} : vector<8x32xf32>, vector<32x512xf32>, vector<8x512xf32> -> vector<8x512xf32>
    %43 = arith.addf %38, %42 : vector<8x512xf32>
    %cst_33 = arith.constant 2.000000e-01 : f32
    %44 = vector.broadcast %cst_33 : f32 to vector<8x512xf32>
    %45 = arith.mulf %44, %43 : vector<8x512xf32>
    %46 = arith.maximumf %43, %45 : vector<8x512xf32>
    %c0_34 = arith.constant 0 : index
    %c0_35 = arith.constant 0 : index
    %c0_36 = arith.constant 0 : index
    %c0_37 = arith.constant 0 : index
    %47 = vector.load %arg6[%c0_34, %c0_35, %c0_36, %c0_37] : memref<1x4x8x512xf32, #tpu.memory_space<vmem>>, vector<1x1x8x512xf32>
    %48 = vector.shape_cast %47 : vector<1x1x8x512xf32> to vector<8x512xf32>
    %49 = vector.shape_cast %46 : vector<8x512xf32> to vector<1x1x8x512xf32>
    tpu.vector_store %arg6[%c0_34, %c0_35, %c0_36, %c0_37], %49 {strides = array<i32>} : memref<1x4x8x512xf32, #tpu.memory_space<vmem>>, vector<1x1x8x512xf32>,
    %c1_38 = arith.constant 1 : index
    %c0_39 = arith.constant 0 : index
    %c0_40 = arith.constant 0 : index
    %50 = vector.load %arg5[%c1_38, %c0_39, %c0_40] : memref<4x8x512xf32, #tpu.memory_space<vmem>>, vector<1x8x512xf32>
    %51 = vector.shape_cast %50 : vector<1x8x512xf32> to vector<8x512xf32>
    %c16_41 = arith.constant 16 : index
    %c0_42 = arith.constant 0 : index
    %52 = vector.load %arg7[%c16_41, %c0_42] : memref<48x768xf32, #tpu.memory_space<vmem>>, vector<32x512xf32>
    %c2 = arith.constant 2 : index
    %c0_43 = arith.constant 0 : index
    %c0_44 = arith.constant 0 : index
    %53 = vector.load %arg4[%c2, %c0_43, %c0_44] : memref<8x8x32xf32, #tpu.memory_space<vmem>>, vector<1x8x32xf32>
    %54 = vector.shape_cast %53 : vector<1x8x32xf32> to vector<8x32xf32>
    %cst_45 = arith.constant dense<0.000000e+00> : vector<8x512xf32>
    %55 = tpu.matmul %54, %52, %cst_45 {dimension_numbers = #tpu.dot_dimension_numbers<[1], [0], [0], [1], [0, 0, 1, 1], [], []>} : vector<8x32xf32>, vector<32x512xf32>, vector<8x512xf32> -> vector<8x512xf32>
    %56 = arith.addf %51, %55 : vector<8x512xf32>
    %c16_46 = arith.constant 16 : index
    %c128_47 = arith.constant 128 : index
    %57 = vector.load %arg7[%c16_46, %c128_47] : memref<48x768xf32, #tpu.memory_space<vmem>>, vector<32x512xf32>
    %c3 = arith.constant 3 : index
    %c0_48 = arith.constant 0 : index
    %c0_49 = arith.constant 0 : index
    %58 = vector.load %arg4[%c3, %c0_48, %c0_49] : memref<8x8x32xf32, #tpu.memory_space<vmem>>, vector<1x8x32xf32>
    %59 = vector.shape_cast %58 : vector<1x8x32xf32> to vector<8x32xf32>
    %cst_50 = arith.constant dense<0.000000e+00> : vector<8x512xf32>
    %60 = tpu.matmul %59, %57, %cst_50 {dimension_numbers = #tpu.dot_dimension_numbers<[1], [0], [0], [1], [0, 0, 1, 1], [], []>} : vector<8x32xf32>, vector<32x512xf32>, vector<8x512xf32> -> vector<8x512xf32>
    %61 = arith.addf %56, %60 : vector<8x512xf32>
    %cst_51 = arith.constant 2.000000e-01 : f32
    %62 = vector.broadcast %cst_51 : f32 to vector<8x512xf32>
    %63 = arith.mulf %62, %61 : vector<8x512xf32>
    %64 = arith.maximumf %61, %63 : vector<8x512xf32>
    %c0_52 = arith.constant 0 : index
    %c1_53 = arith.constant 1 : index
    %c0_54 = arith.constant 0 : index
    %c0_55 = arith.constant 0 : index
    %65 = vector.load %arg6[%c0_52, %c1_53, %c0_54, %c0_55] : memref<1x4x8x512xf32, #tpu.memory_space<vmem>>, vector<1x1x8x512xf32>
    %66 = vector.shape_cast %65 : vector<1x1x8x512xf32> to vector<8x512xf32>
    %67 = vector.shape_cast %64 : vector<8x512xf32> to vector<1x1x8x512xf32>
    tpu.vector_store %arg6[%c0_52, %c1_53, %c0_54, %c0_55], %67 {strides = array<i32>} : memref<1x4x8x512xf32, #tpu.memory_space<vmem>>, vector<1x1x8x512xf32>,
    %c2_56 = arith.constant 2 : index
    %c0_57 = arith.constant 0 : index
    %c0_58 = arith.constant 0 : index
    %68 = vector.load %arg5[%c2_56, %c0_57, %c0_58] : memref<4x8x512xf32, #tpu.memory_space<vmem>>, vector<1x8x512xf32>
    %69 = vector.shape_cast %68 : vector<1x8x512xf32> to vector<8x512xf32>
    %c0_59 = arith.constant 0 : index
    %c128_60 = arith.constant 128 : index
    %70 = vector.load %arg7[%c0_59, %c128_60] : memref<48x768xf32, #tpu.memory_space<vmem>>, vector<32x512xf32>
    %c4 = arith.constant 4 : index
    %c0_61 = arith.constant 0 : index
    %c0_62 = arith.constant 0 : index
    %71 = vector.load %arg4[%c4, %c0_61, %c0_62] : memref<8x8x32xf32, #tpu.memory_space<vmem>>, vector<1x8x32xf32>
    %72 = vector.shape_cast %71 : vector<1x8x32xf32> to vector<8x32xf32>
    %cst_63 = arith.constant dense<0.000000e+00> : vector<8x512xf32>
    %73 = tpu.matmul %72, %70, %cst_63 {dimension_numbers = #tpu.dot_dimension_numbers<[1], [0], [0], [1], [0, 0, 1, 1], [], []>} : vector<8x32xf32>, vector<32x512xf32>, vector<8x512xf32> -> vector<8x512xf32>
    %74 = arith.addf %69, %73 : vector<8x512xf32>
    %c0_64 = arith.constant 0 : index
    %c256 = arith.constant 256 : index
    %75 = vector.load %arg7[%c0_64, %c256] : memref<48x768xf32, #tpu.memory_space<vmem>>, vector<32x512xf32>
    %c5 = arith.constant 5 : index
    %c0_65 = arith.constant 0 : index
    %c0_66 = arith.constant 0 : index
    %76 = vector.load %arg4[%c5, %c0_65, %c0_66] : memref<8x8x32xf32, #tpu.memory_space<vmem>>, vector<1x8x32xf32>
    %77 = vector.shape_cast %76 : vector<1x8x32xf32> to vector<8x32xf32>
    %cst_67 = arith.constant dense<0.000000e+00> : vector<8x512xf32>
    %78 = tpu.matmul %77, %75, %cst_67 {dimension_numbers = #tpu.dot_dimension_numbers<[1], [0], [0], [1], [0, 0, 1, 1], [], []>} : vector<8x32xf32>, vector<32x512xf32>, vector<8x512xf32> -> vector<8x512xf32>
    %79 = arith.addf %74, %78 : vector<8x512xf32>
    %cst_68 = arith.constant 2.000000e-01 : f32
    %80 = vector.broadcast %cst_68 : f32 to vector<8x512xf32>
    %81 = arith.mulf %80, %79 : vector<8x512xf32>
    %82 = arith.maximumf %79, %81 : vector<8x512xf32>
    %c0_69 = arith.constant 0 : index
    %c2_70 = arith.constant 2 : index
    %c0_71 = arith.constant 0 : index
    %c0_72 = arith.constant 0 : index
    %83 = vector.load %arg6[%c0_69, %c2_70, %c0_71, %c0_72] : memref<1x4x8x512xf32, #tpu.memory_space<vmem>>, vector<1x1x8x512xf32>
    %84 = vector.shape_cast %83 : vector<1x1x8x512xf32> to vector<8x512xf32>
    %85 = vector.shape_cast %82 : vector<8x512xf32> to vector<1x1x8x512xf32>
    tpu.vector_store %arg6[%c0_69, %c2_70, %c0_71, %c0_72], %85 {strides = array<i32>} : memref<1x4x8x512xf32, #tpu.memory_space<vmem>>, vector<1x1x8x512xf32>,
    %c3_73 = arith.constant 3 : index
    %c0_74 = arith.constant 0 : index
    %c0_75 = arith.constant 0 : index
    %86 = vector.load %arg5[%c3_73, %c0_74, %c0_75] : memref<4x8x512xf32, #tpu.memory_space<vmem>>, vector<1x8x512xf32>
    %87 = vector.shape_cast %86 : vector<1x8x512xf32> to vector<8x512xf32>
    %c16_76 = arith.constant 16 : index
    %c128_77 = arith.constant 128 : index
    %88 = vector.load %arg7[%c16_76, %c128_77] : memref<48x768xf32, #tpu.memory_space<vmem>>, vector<32x512xf32>
    %c6 = arith.constant 6 : index
    %c0_78 = arith.constant 0 : index
    %c0_79 = arith.constant 0 : index
    %89 = vector.load %arg4[%c6, %c0_78, %c0_79] : memref<8x8x32xf32, #tpu.memory_space<vmem>>, vector<1x8x32xf32>
    %90 = vector.shape_cast %89 : vector<1x8x32xf32> to vector<8x32xf32>
    %cst_80 = arith.constant dense<0.000000e+00> : vector<8x512xf32>
    %91 = tpu.matmul %90, %88, %cst_80 {dimension_numbers = #tpu.dot_dimension_numbers<[1], [0], [0], [1], [0, 0, 1, 1], [], []>} : vector<8x32xf32>, vector<32x512xf32>, vector<8x512xf32> -> vector<8x512xf32>
    %92 = arith.addf %87, %91 : vector<8x512xf32>
    %c16_81 = arith.constant 16 : index
    %c256_82 = arith.constant 256 : index
    %93 = vector.load %arg7[%c16_81, %c256_82] : memref<48x768xf32, #tpu.memory_space<vmem>>, vector<32x512xf32>
    %c7 = arith.constant 7 : index
    %c0_83 = arith.constant 0 : index
    %c0_84 = arith.constant 0 : index
    %94 = vector.load %arg4[%c7, %c0_83, %c0_84] : memref<8x8x32xf32, #tpu.memory_space<vmem>>, vector<1x8x32xf32>
    %95 = vector.shape_cast %94 : vector<1x8x32xf32> to vector<8x32xf32>
    %cst_85 = arith.constant dense<0.000000e+00> : vector<8x512xf32>
    %96 = tpu.matmul %95, %93, %cst_85 {dimension_numbers = #tpu.dot_dimension_numbers<[1], [0], [0], [1], [0, 0, 1, 1], [], []>} : vector<8x32xf32>, vector<32x512xf32>, vector<8x512xf32> -> vector<8x512xf32>
    %97 = arith.addf %92, %96 : vector<8x512xf32>
    %cst_86 = arith.constant 2.000000e-01 : f32
    %98 = vector.broadcast %cst_86 : f32 to vector<8x512xf32>
    %99 = arith.mulf %98, %97 : vector<8x512xf32>
    %100 = arith.maximumf %97, %99 : vector<8x512xf32>
    %c0_87 = arith.constant 0 : index
    %c3_88 = arith.constant 3 : index
    %c0_89 = arith.constant 0 : index
    %c0_90 = arith.constant 0 : index
    %101 = vector.load %arg6[%c0_87, %c3_88, %c0_89, %c0_90] : memref<1x4x8x512xf32, #tpu.memory_space<vmem>>, vector<1x1x8x512xf32>
    %102 = vector.shape_cast %101 : vector<1x1x8x512xf32> to vector<8x512xf32>
    %103 = vector.shape_cast %100 : vector<8x512xf32> to vector<1x1x8x512xf32>
    tpu.vector_store %arg6[%c0_87, %c3_88, %c0_89, %c0_90], %103 {strides = array<i32>} : memref<1x4x8x512xf32, #tpu.memory_space<vmem>>, vector<1x1x8x512xf32>,
    return
  }
  func.func @transform_0(%arg0: i32, %arg1: i32) -> (i32, i32, i32) {
    %c0_i32 = arith.constant 0 : i32
    %c0_i32_0 = arith.constant 0 : i32
    return %arg1, %c0_i32, %arg0 : i32, i32, i32
  }
  func.func @transform_1(%arg0: i32, %arg1: i32) -> (i32, i32, i32) {
    %c4_i32 = arith.constant 4 : i32
    %0 = arith.muli %arg1, %c4_i32 : i32
    %1 = arith.addi %0, %arg0 : i32
    %c0_i32 = arith.constant 0 : i32
    %c0_i32_0 = arith.constant 0 : i32
    %c0_i32_1 = arith.constant 0 : i32
    return %1, %c0_i32, %c0_i32_0 : i32, i32, i32
  }
  func.func @transform_2(%arg0: i32, %arg1: i32) -> (i32, i32, i32) {
    %c0_i32 = arith.constant 0 : i32
    %c0_i32_0 = arith.constant 0 : i32
    %c0_i32_1 = arith.constant 0 : i32
    %c0_i32_2 = arith.constant 0 : i32
    return %c0_i32, %c0_i32_0, %c0_i32_1 : i32, i32, i32
  }
  func.func @transform_3(%arg0: i32, %arg1: i32) -> (i32, i32, i32) {
    %c0_i32 = arith.constant 0 : i32
    %c0_i32_0 = arith.constant 0 : i32
    %c0_i32_1 = arith.constant 0 : i32
    return %c0_i32, %c0_i32_0, %arg0 : i32, i32, i32
  }
  func.func @transform_4(%arg0: i32, %arg1: i32) -> (i32, i32, i32, i32) {
    %c0_i32 = arith.constant 0 : i32
    %c0_i32_0 = arith.constant 0 : i32
    %c0_i32_1 = arith.constant 0 : i32
    return %arg1, %c0_i32, %c0_i32_0, %arg0 : i32, i32, i32, i32
  }
}

</mosaic_0001>

<bundles_post_ra>
// kernel: tpu_custom_call.1
= control target key start
LH: loop header
LB: loop body
LE: loop exit
PB: predicated region body
PF: predicated region fallthrough
CT: control target
= control target key end

     0   :  { %s3836_s0 = inlined_call_operand.hbm [shape: f32[2,16,2048], index: 0, kind: input, shape index: {}]   ;;  %s3837_s1 = inlined_call_operand.hbm [shape: f32[8,16,256], index: 1, kind: input, shape index: {}]   ;;  %s3838_s2 = inlined_call_operand.hbm [shape: f32[8,8,32], index: 2, kind: input, shape index: {}]   ;;  %s3839_s3 = inlined_call_operand.hbm [shape: f32[4,8,2048], index: 3, kind: input, shape index: {}]   ;;  %s3840_s4 = inlined_call_operand.hbm [shape: f32[2,4,8,2048], index: 4, kind: output, shape index: {}]  }
   0x1   :  { %3864 = sst [smem:[#allocation28_spill]] %s3836_s0 }
   0x2   :  { %3865 = sst [smem:[#allocation29_spill]] %s3838_s2 }
   0x3   :  { %3866 = sst [smem:[#allocation30_spill]] %s3840_s4 }
   0x4   :  { %9 = vsyncpa [#allocation4], 0 }
   0x5   :  { %11 = vsyncpa [#allocation4 + $0x1], 0 }
   0x6   :  { %12 = vsyncpa [#allocation7], 0 }
   0x7   :  { %14 = vsyncpa [#allocation7 + $0x1], 0 }
   0x8   :  { %15 = vsyncpa [#allocation10], 0 }
   0x9   :  { %17 = vsyncpa [#allocation10 + $0x1], 0 }
   0xa   :  { %18 = vsyncpa [#allocation5], 0 }
   0xb   :  { %20 = vsyncpa [#allocation5 + $0x1], 0  ;;  %s3020_s15 = smov 0   ;;  %s3022_s16 = smov 0  }
   0xc   :  { %s3024_s17 = smov 0   ;;  %s3026_s18 = smov 0  }
   0xd   :  { %s3028_s19 = smov 0   ;;  %s3030_s20 = smov 0  }
   0xe   :  { %s3032_s21 = smov 0   ;;  %s3034_s22 = smov 0  }
   0xf   :  { %s3036_s23 = smov 0   ;;  %s3038_s24 = smov 0  }
  0x10   :  { %s3040_s25 = smov 0   ;;  %s3042_s26 = smov 0  }
  0x11   :  { %s3044_s27 = smov 0   ;;  %s3046_s28 = smov 0  }
  0x12 LB: > { %3867 = sst [smem:[#allocation17_spill]] %s2939_s19  ;;  %s3091_s29 = sadd.s32 4294967295, %s2975_s28   ;;  %s2975_s28 = sphi %s3046_s28, %s26_s28   ;;  %s2971_s27 = sphi %s3044_s27, %s3957_s27   ;;  %s2967_s26 = sphi %s3042_s26, %s3945_s26   ;;  %s2963_s25 = sphi %s3040_s25, %s3956_s25   ;;  %s2959_s24 = sphi %s3038_s24, %s3944_s24   ;;  %s2955_s23 = sphi %s3036_s23, %s3955_s23   ;;  %s2951_s22 = sphi %s3034_s22, %s3954_s22   ;;  %s2947_s21 = sphi %s3032_s21, %s3953_s21   ;;  %s2943_s20 = sphi %s3030_s20, %s3952_s20   ;;  %s2939_s19 = sphi %s3028_s19, %s3951_s19   ;;  %s2935_s18 = sphi %s3026_s18, %s3950_s18   ;;  %s2931_s17 = sphi %s3024_s17, %s3949_s17   ;;  %s2927_s16 = sphi %s3022_s16, %s3948_s16   ;;  %s2923_s15 = sphi %s3020_s15, %s3947_s15  }
  0x13   : > { %3868 = sst [smem:[#allocation18_spill]] %s2947_s21  ;;  %p2155_p0 = scmp.ge.s32.totalorder %s2975_s28, 1 }
  0x14   : > { %3869 = sst [smem:[#allocation19_spill]] %s2951_s22  ;;  %p3841_p1 = scmp.eq.s32.totalorder %s3091_s29, 0 }
  0x15   : > { %3870 = sst [smem:[#allocation20_spill]] %s2959_s24  ;;  %p176_p3 = scmp.lt.s32.totalorder %s2975_s28, 9 }
  0x16   : > { %3871 = sst [smem:[#allocation21_spill]] %s2963_s25  ;;  %s2977_s5 = smov [#allocation8]  }
  0x17   : > { %3872 = sst [smem:[#allocation22_spill]] %s2967_s26  ;;  %p3097_p4 = pnand %p2155_p0, %p176_p3 }
  0x18   : > { %s188_s6 = sshll.u32 %s2977_s5, 4  ;;  %s3875_s2 = sld [smem:[#allocation29_spill]]  ;;  %s189_s6 = int_to_ptr.vmem [resolvable:$true] %s188_s6 }
  0x19   : > { %s3873_s30 = scalar_select %p3097_p4, 1, 0 }
  0x1a   : > { %p2491_p5 = pneg %p3097_p4 }
  0x1c   : > { %p3105_p6 = pnand %p2491_p5, %p3841_p1 }
  0x1e   : > { %s2699_s10 = scalar_lea.hbm %s3875_s2, 1024  ;;  %p2701_p8 = pneg %p3105_p6 }
  0x1f   : > { %p2700_p7 = scmp.ne.s32.totalorder %s3875_s2, %s2699_s10  ;;  %p2706_p11 = scmp.lt.u32.totalorder %s2699_s10, %s3875_s2 }
  0x21   : > { %p2702_p9 = pnand %p2701_p8, %p2700_p7 }
  0x23   : > { %p2703_p10 = pneg %p2702_p9 }
  0x25   : > { %p2708_p12 = pnand %p2706_p11, %p2703_p10 }
  0x27   : > { %2711 = shalt.err (!%p2708_p12)
}
  0x28   : > { %s2712_s5 = scalar_lea.vmem %s189_s6, 1024  ;;  %p2720_p5 = scmp.lt.s32.totalorder %s189_s6, %s189_s6 }
  0x29   : > { %p2713_p13 = scmp.ne.s32.totalorder %s189_s6, %s2712_s5  ;;  %p2721_p1 = scmp.lt.s32.totalorder %s2712_s5, %s2712_s5 }
  0x2b   : > { %p2715_p0 = pnand %p2713_p13, %p2701_p8  ;;  %p2722_p2 = por %p2721_p1, %p2720_p5 }
  0x2d   : > { %p2716_p3 = pneg %p2715_p0 }
  0x2f   : > { %p2723_p4 = pnand %p2722_p2, %p2716_p3 }
  0x31   : > { %2726 = shalt.err (!%p2723_p4)
}
  0x32   : > { %s2978_s8 = smov 128   ;;  %s2979_s9 = smov 8  }
  0x33   : > { %2494 = dma.hbm_to_vmem [thread:$0]  (!%p3105_p6), %s3875_s2, 1024, %s189_s6, [#allocation7], %s2978_s8, %s2978_s8, %s2979_s9  }
  0x34   : > { %s2152_s12 = sadd.s32 4294967294, %s2975_s28   ;;  %p54_p1 = scmp.ne.s32.totalorder %s2955_s23, %s2951_s22 }
  0x35   : > { %p3849_p2 = scmp.eq.s32.totalorder %s2975_s28, 0  ;;  %p60_p4 = scmp.ne.s32.totalorder %s2951_s22, %s2947_s21 }
  0x36   : > { %p169_p7 = scmp.eq.s32.totalorder %s2152_s12, 7  ;;  %p3877_p9 = scmp.eq.s32.totalorder %s3091_s29, 7 }
  0x37   : > { %p3134_p8 = por %p3849_p2, %p54_p1  ;;  %p3880_p11 = scmp.eq.s32.totalorder %s3091_s29, 0 }
  0x38   : > { %p3140_p10 = por %p3877_p9, %p54_p1  ;;  %p3150_p12 = por %p169_p7, %p60_p4 }
  0x39   : > { %p3146_p6 = por %p3880_p11, %p60_p4  ;;  %p3848_p13 = scmp.lt.s32.totalorder %s2975_s28, 8 }
  0x3a   : > { %s3878_s7 = scalar_select %p3140_p10, 1, 0 }
  0x3b   : > { %s3881_s6 = scalar_select %p3146_p6, 1, 0 }
  0x3c   : > { %3879 = sst [smem:[#allocation23_spill]] %s3878_s7  ;;  %s202_s8 = sand.u32 1, %s2955_s23  }
  0x3d   : > { %3882 = sst [smem:[#allocation24_spill]] %s3881_s6  ;;  %s2158_s9 = sshll.u32 %s202_s8, 6 }
  0x3e   : > { %s3883_s5 = scalar_select %p3150_p12, 1, 0 }
  0x3f   : > { %s2159_s10 = sshll.u32 %s2971_s27, 2  ;;  %s2160_s11 = sshll.u32 %s2967_s26, 5 }
  0x40   : > { %3884 = sst [smem:[#allocation25_spill]] %s3883_s5  ;;  %s206_s12 = scalar_lea.vmem [#allocation3], %s2158_s9 }
  0x41   : > { %s215_s13 = sshll.u32 %s206_s12, 4  ;;  %s212_s2 = sadd.s32 %s2160_s11, %s2159_s10  ;;  %s3158_s13 = int_to_ptr.vmem [resolvable:$true] %s215_s13 }
  0x42   : > { %s2161_s21 = sshll.u32 %s212_s2, 7  ;;  %p3164_p0 = pnand %p3848_p13, %p3134_p8 }
  0x43   : > { %s3886_s0 = sld [smem:[#allocation28_spill]]  ;;  %s3173_s9 = scalar_lea.sflag [#allocation4], %s202_s8 }
  0x44   : > { %p2729_p5 = pneg %p3164_p0 }
  0x49   : > { %s3171_s5 = scalar_lea.hbm %s3886_s0, %s2161_s21  ;;  %s2732_s7 = scalar_lea.hbm %s3886_s0, 8192 }
  0x4a   : > { %s2727_s2 = scalar_lea.hbm %s3171_s5, 1024  ;;  %p2733_p7 = scmp.lt.u32.totalorder %s3171_s5, %s3886_s0 }
  0x4b   : > { %p2728_p3 = scmp.ne.s32.totalorder %s3171_s5, %s2727_s2  ;;  %p2734_p8 = scmp.lt.u32.totalorder %s2732_s7, %s2727_s2 }
  0x4c   : > { %p2736_p11 = scmp.lt.u32.totalorder %s2727_s2, %s3171_s5 }
  0x4d   : > { %p2730_p1 = pnand %p2729_p5, %p2728_p3  ;;  %p2735_p9 = por %p2734_p8, %p2733_p7 }
  0x4f   : > { %p2731_p4 = pneg %p2730_p1  ;;  %p2737_p13 = por %p2736_p11, %p2735_p9 }
  0x51   : > { %p2738_p2 = pnand %p2737_p13, %p2731_p4 }
  0x53   : > { %2741 = shalt.err (!%p2738_p2)
}
  0x54   : > { %s2742_s8 = scalar_lea.vmem %s3158_s13, 1024  ;;  %s2980_s11 = smov [#allocation3]  }
  0x55   : > { %p2743_p3 = scmp.ne.s32.totalorder %s3158_s13, %s2742_s8  ;;  %s2747_s12 = sshll.u32 %s2980_s11, 4  ;;  %s2748_s12 = int_to_ptr.vmem [resolvable:$false] %s2747_s12 }
  0x56   : > { %s2749_s14 = scalar_lea.vmem %s2748_s12, 2048  ;;  %p2750_p10 = scmp.lt.s32.totalorder %s3158_s13, %s2748_s12 }
  0x57   : > { %p2745_p1 = pnand %p2743_p3, %p2729_p5  ;;  %p2751_p7 = scmp.lt.s32.totalorder %s2749_s14, %s2742_s8 }
  0x59   : > { %p2746_p12 = pneg %p2745_p1  ;;  %p2752_p8 = por %p2751_p7, %p2750_p10 }
  0x5b   : > { %p2753_p9 = pnand %p2752_p8, %p2746_p12 }
  0x5d   : > { %2756 = shalt.err (!%p2753_p9)
}
  0x5e   : > { %s3851_s2 = smov 2048   ;;  %s3852_s24 = smov 512  }
  0x5f   : > { %s3853_s7 = smov 32   ;;  %s35_s21 = sadd.s32 1, %s2967_s26 }
  0x60   : > { %2498 = dma.hbm_to_vmem [thread:$0]  (!%p3164_p0), %s3171_s5, 1024, %s3158_s13, %s3173_s9, %s3851_s2, %s3852_s24, %s3853_s7  }
  0x61   : > { %p36_p2 = scmp.ge.s32.totalorder %s35_s21, 2  ;;  %s38_s10 = sadd.s32 1, %s2971_s27 }
  0x62   : > { %s2153_s8 = sshll.u32 %s2967_s26, 2  ;;  %s77_s11 = sadd.s32 1, %s2943_s20 }
  0x63   : > { %s3959_s21 = smov (%p36_p2, %s35_s21), 0  ;;  %s3961_s10 = smov (!%p36_p2, %s38_s10), %s2971_s27 }
  0x64   : > { %3887 = sst [smem:[#allocation26_spill]] %s3959_s21  ;;  %s42_s12 = ssub.s32 %s2967_s26, %s3959_s21 }
  0x65   : > { %s71_s4 = sadd.s32 %s2971_s27, %s2153_s8  ;;  %p40_p10 = scmp.ge.s32.totalorder %s3961_s10, 4 }
  0x66   : > { %s2154_s13 = sshll.u32 %s3959_s21, 2  ;;  %p84_p12 = scmp.ne.s32.totalorder %s2943_s20, %s2939_s19 }
  0x67   : > { %p90_p13 = scmp.ne.s32.totalorder %s2939_s19, %s2935_s18  ;;  %s3963_s10 = smov (%p40_p10, %s3961_s10), 0 }
  0x68   : > { %p3888_p0 = scmp.eq.s32.totalorder %s2975_s28, 0  ;;  %p3890_p4 = scmp.eq.s32.totalorder %s3091_s29, 0 }
  0x69   : > { %s3235_s14 = ssub.s32 %s2971_s27, %s3963_s10  ;;  %s73_s18 = sadd.s32 %s2154_s13, %s3963_s10 }
  0x6a   : > { %p3223_p5 = por %p84_p12, %p3888_p0  ;;  %p3229_p11 = por %p90_p13, %p3890_p4 }
  0x6b   : > { %s44_s8 = sor.u32 %s3235_s14, %s42_s12  ;;  %s74_s2 = ssub.s32 %s71_s4, %s73_s18 }
  0x6c   : > { %s3891_s9 = scalar_select %p3229_p11, 1, 0 }
  0x6d   : > { %p45_p3 = scmp.eq.s32.totalorder %s44_s8, 0  ;;  %p75_p1 = scmp.eq.s32.totalorder %s74_s2, 0 }
  0x6e   : > { %3892 = sst [smem:[#allocation27_spill]] %s3891_s9  ;;  %s225_s24 = sand.u32 1, %s2975_s28  }
  0x6f   : > { %s3893_s7 = sadd.s32 1, %s2955_s23  ;;  %s227_s26 = sand.u32 1, %s2943_s20  }
  0x70   : > { %s3244_s0 = scalar_select %p45_p3, %s2955_s23, %s3893_s7  }
  0x71   : > { %s3247_s21 = scalar_select %p75_p1, %s2943_s20, %s77_s11  }
  0x72   : > { %s2162_s25 = sshll.u32 %s227_s26, 5  ;;  %s2221_s9 = sshll.u32 %s71_s4, 9 }
  0x73   : > { %s3253_s22 = scalar_lea.hbm %s3837_s1, %s2221_s9  ;;  %s229_s2 = scalar_lea.vmem [#allocation6], %s2162_s25 }
  0x74   : > { %s238_s12 = sshll.u32 %s229_s2, 4  ;;  %p3894_p8 = scmp.lt.s32.totalorder %s2975_s28, 8  ;;  %s3263_s12 = int_to_ptr.vmem [resolvable:$true] %s238_s12 }
  0x75   : > { %s3265_s26 = scalar_lea.sflag [#allocation7], %s225_s24  ;;  %s2757_s19 = scalar_lea.hbm %s3253_s22, 512 }
  0x76   : > { %p3259_p9 = pnand %p3894_p8, %p3223_p5  ;;  %p2758_p2 = scmp.ne.s32.totalorder %s3253_s22, %s2757_s19 }
  0x77   : > { %s2762_s11 = scalar_lea.hbm %s3837_s1, 4096  ;;  %p2763_p0 = scmp.lt.u32.totalorder %s3253_s22, %s3837_s1 }
  0x78   : > { %p2759_p10 = pneg %p3259_p9  ;;  %p2764_p5 = scmp.lt.u32.totalorder %s2762_s11, %s2757_s19 }
  0x79   : > { %p2766_p3 = scmp.lt.u32.totalorder %s2757_s19, %s3253_s22 }
  0x7a   : > { %p2760_p12 = pnand %p2759_p10, %p2758_p2  ;;  %p2765_p4 = por %p2764_p5, %p2763_p0 }
  0x7c   : > { %p2761_p13 = pneg %p2760_p12  ;;  %p2767_p1 = por %p2766_p3, %p2765_p4 }
  0x7e   : > { %p2768_p8 = pnand %p2767_p1, %p2761_p13 }
  0x80   : > { %2771 = shalt.err (!%p2768_p8)
}
  0x81   : > { %s2772_s24 = scalar_lea.vmem %s3263_s12, 512  ;;  %s2984_s5 = smov [#allocation6]  }
  0x82   : > { %p2773_p2 = scmp.ne.s32.totalorder %s3263_s12, %s2772_s24  ;;  %s2777_s9 = sshll.u32 %s2984_s5, 4  ;;  %s2778_s9 = int_to_ptr.vmem [resolvable:$false] %s2777_s9 }
  0x83   : > { %s2779_s18 = scalar_lea.vmem %s2778_s9, 1024  ;;  %p2780_p11 = scmp.lt.s32.totalorder %s3263_s12, %s2778_s9 }
  0x84   : > { %p2775_p12 = pnand %p2773_p2, %p2759_p10  ;;  %p2781_p0 = scmp.lt.s32.totalorder %s2779_s18, %s2772_s24 }
  0x86   : > { %p2776_p7 = pneg %p2775_p12  ;;  %p2782_p5 = por %p2781_p0, %p2780_p11 }
  0x88   : > { %p2783_p4 = pnand %p2782_p5, %p2776_p7 }
  0x8a   : > { %2786 = shalt.err (!%p2783_p4)
}
  0x8b   : > { %s2985_s8 = smov 256   ;;  %s2986_s2 = smov 16  }
  0x8c   : > { %2501 = dma.hbm_to_vmem [thread:$0]  (!%p3259_p9), %s3253_s22, 512, %s3263_s12, %s3265_s26, %s2985_s8, %s2985_s8, %s2986_s2  }
  0x8d   : > { %s124_s19 = sadd.s32 1, %s2931_s17  ;;  %p131_p11 = scmp.ne.s32.totalorder %s2931_s17, %s2927_s16 }
  0x8e   : > { %p3896_p7 = scmp.eq.s32.totalorder %s3235_s14, 0  ;;  %p3897_p10 = scmp.eq.s32.totalorder %s2975_s28, 0 }
  0x8f   : > { %p137_p3 = scmp.ne.s32.totalorder %s2927_s16, %s2923_s15  ;;  %s248_s6 = sand.u32 1, %s2931_s17  }
  0x90   : > { %s3299_s25 = scalar_select %p3896_p7, %s2931_s17, %s124_s19  }
  0x91   : > { %p133_p13 = por %p131_p11, %p3897_p10  ;;  %s2222_s11 = sshll.u32 %s2971_s27, 9 }
  0x92   : > { %p3898_p1 = scmp.eq.s32.totalorder %s3091_s29, 0  ;;  %s2166_s13 = sshll.u32 %s248_s6, 7 }
  0x93   : > { %s3316_s22 = scalar_lea.hbm %s3839_s3, %s2222_s11  ;;  %p3900_p9 = scmp.lt.s32.totalorder %s2975_s28, 8 }
  0x94   : > { %p3309_p8 = por %p137_p3, %p3898_p1  ;;  %s252_s14 = scalar_lea.vmem [#allocation9], %s2166_s13 }
  0x95   : > { %p3320_p2 = pnand %p3900_p9, %p133_p13  ;;  %s259_s12 = sshll.u32 %s252_s14, 4  ;;  %s3324_s12 = int_to_ptr.vmem [resolvable:$true] %s259_s12 }
  0x96   : > { %s3899_s4 = scalar_select %p3309_p8, 1, 0 }
  0x97   : > { %s3326_s7 = scalar_lea.sflag [#allocation10], %s248_s6  ;;  %s2787_s26 = scalar_lea.hbm %s3316_s22, 2048 }
  0x98   : > { %p2788_p12 = scmp.ne.s32.totalorder %s3316_s22, %s2787_s26  ;;  %p2789_p0 = pneg %p3320_p2 }
  0x99   : > { %s2792_s8 = scalar_lea.hbm %s3839_s3, 8192  ;;  %p2793_p11 = scmp.lt.u32.totalorder %s3316_s22, %s3839_s3 }
  0x9a   : > { %p2790_p5 = pnand %p2789_p0, %p2788_p12  ;;  %p2794_p7 = scmp.lt.u32.totalorder %s2792_s8, %s2787_s26 }
  0x9b   : > { %p2796_p13 = scmp.lt.u32.totalorder %s2787_s26, %s3316_s22 }
  0x9c   : > { %p2791_p4 = pneg %p2790_p5  ;;  %p2795_p10 = por %p2794_p7, %p2793_p11 }
  0x9e   : > { %p2797_p3 = por %p2796_p13, %p2795_p10 }
  0xa0   : > { %p2798_p1 = pnand %p2797_p3, %p2791_p4 }
  0xa2   : > { %2801 = shalt.err (!%p2798_p1)
}
  0xa3   : > { %s2802_s6 = scalar_lea.vmem %s3324_s12, 2048  ;;  %s2987_s11 = smov [#allocation9]  }
  0xa4   : > { %p2803_p9 = scmp.ne.s32.totalorder %s3324_s12, %s2802_s6  ;;  %s2807_s13 = sshll.u32 %s2987_s11, 4  ;;  %s2808_s13 = int_to_ptr.vmem [resolvable:$false] %s2807_s13 }
  0xa5   : > { %s2809_s24 = scalar_lea.vmem %s2808_s13, 4096  ;;  %p2810_p8 = scmp.lt.s32.totalorder %s3324_s12, %s2808_s13 }
  0xa6   : > { %p2805_p12 = pnand %p2803_p9, %p2789_p0  ;;  %p2811_p11 = scmp.lt.s32.totalorder %s2809_s24, %s2802_s6 }
  0xa8   : > { %p2806_p5 = pneg %p2805_p12  ;;  %p2812_p7 = por %p2811_p11, %p2810_p8 }
  0xaa   : > { %p2813_p10 = pnand %p2812_p7, %p2806_p5 }
  0xac   : > { %2816 = shalt.err (!%p2813_p10)
}
  0xad   : > { %s3902_s5 = smov 32   ;;  %s3903_s14 = smov 512  }
  0xae   : > { %s3904_s26 = smov 2048   ;;  %p3905_p0 = scmp.ne.s32.totalorder %s3873_s30, 0 }
  0xaf   : > { %2504 = dma.hbm_to_vmem [thread:$0]  (!%p3320_p2), %s3316_s22, 2048, %s3324_s12, %s3326_s7, %s3904_s26, %s3903_s14, %s3902_s5  }
  0xb0   : > { %271 = sbr.rel (%p3905_p0) target bundleno = 631 (0x277), region = 36  ;;  %s3906_s9 = sld [smem:[#allocation19_spill]] (!%p3905_p0) }
  0xb6   : > { %s3360_s8 = sand.u32 (!%p3905_p0), 1, %s3906_s9  }
  0xb7   : > { %s2170_s2 = sshll.u32 %s3360_s8, 6  ;;  %s274_s19 = scalar_lea.sflag [#allocation4], %s3360_s8 }
  0xb8   : > { %s3364_s6 = scalar_lea.vmem [#allocation3], %s2170_s2 }
  0xb9   : > { %2902 = dma.done.wait (%p3146_p6), %s274_s19, 1024  }
  0xba   : > { %2904 = vsyncadd (%p3146_p6), %s274_s19, 4294966272  ;;  %s3908_s22 = sld [smem:[#allocation17_spill]]  ;;  %s3909_s15 = sld [smem:[#allocation27_spill]] }
  0xbb   : > { %s282_s30 = sand.u32 1, %s3091_s29  }
  0xbc   : > { %s283_s11 = scalar_lea.sflag [#allocation7], %s282_s30 }
  0xc0   : > { %s284_s12 = sand.u32 1, %s3908_s22   ;;  %p3910_p8 = scmp.ne.s32.totalorder %s3909_s15, 0 }
  0xc1   : > { %s2171_s7 = sshll.u32 %s284_s12, 5 }
  0xc2   : > { %s3372_s13 = scalar_lea.vmem [#allocation6], %s2171_s7 }
  0xc3   : > { %2906 = dma.done.wait (%p3910_p8), %s283_s11, 512  }
  0xc4   : > { %2908 = vsyncadd (%p3910_p8), %s283_s11, 4294966784  ;;  %p3911_p2 = scmp.eq.s32.totalorder %s3091_s29, 0 }
  0xc6   : > { %2910 = dma.done.wait (%p3911_p2), [#allocation7], 1024   ;;  %p3912_p4 = pmov %p3911_p2 }
  0xc7   : > { %s295_s24 = sand.u32 1, %s2927_s16   ;;  %p3913_p6 = scmp.ne.s32.totalorder %s3899_s4, 0 }
  0xc8   : > { %2912 = vsyncadd (%p3912_p4), [#allocation7], 4294966272  ;;  %s2173_s5 = sshll.u32 %s295_s24, 7  ;;  %s296_s14 = scalar_lea.sflag [#allocation10], %s295_s24 }
  0xc9   : > { %s3383_s26 = scalar_lea.vmem [#allocation9], %s2173_s5 }
  0xca   : > { %2914 = dma.done.wait (%p3913_p6), %s296_s14, 2048  }
  0xcb   : > { %2916 = vsyncadd (%p3913_p6), %s296_s14, 4294965248  ;;  %v340_v0 = vld [vmem:[%s3372_s13 + $0x10] sm:$0xff]  ;;  %v347_v1 = vld [vmem:[%s3364_s6 + $0x20] sm:$0xff]  ;;  %s2988_s29 = smov 1   ;;  %v2989_v20 = vmov 0.0   ;;  %s2990_s4 = smov 127   ;;  %v375_v30 = vlaneseq }
  0xcc   : > { %v339_v2 = vld [vmem:[%s3372_s13] sm:$0xff]  ;;  %v2649_v3 = vpack.i.bf16 %v347_v1, %v340_v0  ;;  %v348_v5 = vld [vmem:[%s3364_s6 + $0x28] sm:$0xff]  ;;  %v349_v6 = vld [vmem:[%s3364_s6 + $0x30] sm:$0xff]  ;;  %671 = vmatprep.mubr.f32.mxu0 %v2989_v20  ;;  %742 = vmatprep.mubr.f32.mxu1 %v2989_v20  ;;  %vm436_vm0 = vcmask 7168   ;;  %vm603_vm10 = vcmask 261120   ;;  %vm521_vm12 = vcmask 1039360  }
  0xcd   : > { %v343_v4 = vld [vmem:[%s3364_s6] sm:$0xff]  ;;  %v344_v9 = vld [vmem:[%s3364_s6 + $0x8] sm:$0xff]  ;;  %v345_v10 = vld [vmem:[%s3364_s6 + $0x10] sm:$0xff]  ;;  %v2654_v11 = vpack.i.bf16 %v349_v6, %v348_v5  ;;  %v3409_v18 = vpack.c.bf16 %v340_v0, %v339_v2  ;;  %v2674_v22 = vpack.i.bf16 %v348_v5, %v347_v1  ;;  %v2684_v24 = vpack.i.bf16 %v340_v0, %v339_v2  ;;  %s2174_s9 = sshll.u32 %s3360_s8, 7  ;;  %s3932_s2 = sld [smem:[#allocation21_spill]] }
  0xce   : > { %v3395_v7 = vpack.c.bf16 %v347_v1, %v343_v4  ;;  %v2639_v8 = vpack.i.bf16 %v343_v4, %v339_v2  ;;  %2650 = vrot.lane.b32.xlu1 %v2649_v3, %s2988_s29  ;;  %v3400_v12 = vpack.c.bf16 %v349_v6, %v345_v10  ;;  %v3402_v13 = vpack.c.bf16 %v348_v5, %v344_v9  ;;  %v346_v14 = vld [vmem:[%s3364_s6 + $0x18] sm:$0xff]  ;;  %v359_v26 = vld [vmem:[%s3372_s13 + $0x8] sm:$0xff]  ;;  %s3720_s18 = scalar_lea.vmem [#allocation11], %s2174_s9  ;;  %s3933_s19 = sld [smem:[#allocation20_spill]] }
  0xcf   : > { %v350_v15 = vld [vmem:[%s3364_s6 + $0x38] sm:$0xff]  ;;  %v2644_v16 = vpack.i.bf16 %v345_v10, %v344_v9  ;;  %v2664_v19 = vpack.i.bf16 %v344_v9, %v343_v4  ;;  %v2669_v23 = vpack.i.bf16 %v346_v14, %v345_v10  ;;  %v3421_v31 = vand.u32 127, %v375_v30  ;;  %v1473_v1 = vld [vmem:[#allocation8 + $0x28] sm:$0xff]  ;;  %s3934_s12 = sld [smem:[#allocation23_spill]]  ;;  %s2004_s7 = sshll.u32 %s3720_s18, 4  ;;  %s3756_s7 = int_to_ptr.vmem [resolvable:$true] %s2004_s7 }
  0xd0   : > { %2640 = vrot.lane.b32.xlu0 %v2639_v8, %s2988_s29  ;;  %v3407_v17 = vpack.c.bf16 %v350_v15, %v346_v14  ;;  %v2659_v21 = vpack.i.bf16 %v350_v15, %v346_v14  ;;  %v2679_v25 = vpack.i.bf16 %v350_v15, %v349_v6  ;;  %v360_v27 = vld [vmem:[%s3372_s13 + $0x18] sm:$0xff]  ;;  %v602_v14 = vld [vmem:[#allocation8] sm:$0xff]  ;;  %s3935_s24 = sld [smem:[#allocation30_spill]] }
  0xd1   : > { %v2694_v28 = vpack.i.bf16 %v360_v27, %v359_v26  ;;  %v3419_v29 = vpack.c.bf16 %v360_v27, %v359_v26  ;;  %v3424_v32 = vadd.s32 128, %v3421_v31  ;;  %v3427_v33 = vadd.s32 384, %v3421_v31 }
  0xd2   : > { %2655 = vrot.lane.b32.xlu1 %v2654_v11, %s2988_s29  ;;  %v3431_v35 = vadd.s32 256, %v3421_v31  ;;  %vm388_vm2 = vcmp.ne.s32.totalorder %v3421_v31, 0  ;;  %v3441_v46 = vadd.s32 512, %v3421_v31  ;;  %vm394_vm15 = vcmp.ne.s32.totalorder %v3421_v31, 127 }
  0xd3   : > { %v383_v34 = vand.u32 127, %v3424_v32  ;;  %v385_v37 = vand.u32 127, %v3427_v33  ;;  %vm2291_vm5 = vmpackc.low %vm388_vm2, %vm388_vm2  ;;  %s2216_s6 = sshll.u32 %s3932_s2, 2 }
  0xd4   : > { %2645 = vrot.lane.b32.xlu0 %v2644_v16, %s2988_s29  ;;  %v384_v43 = vand.u32 127, %v3431_v35  ;;  %v386_v61 = vand.u32 127, %v3441_v46  ;;  %vm2335_vm2 = vmpackc.low %vm394_vm15, %vm394_vm15  ;;  %v2193_v46 = vld [vmem:[%s3383_s26 + $0x50] sm:$0xff]  ;;  %s2217_s22 = sshll.u32 %s3933_s19, 6 }
  0xd5   : > { %vm389_vm1 = vcmp.ne.s32.totalorder %v383_v34, 0  ;;  %vm3451_vm4 = vcmp.ne.s32.totalorder %v385_v37, 0  ;;  %vm395_vm13 = vcmp.ne.s32.totalorder %v383_v34, 127  ;;  %v2182_v34 = vld [vmem:[%s3383_s26 + $0x38] sm:$0xff]  ;;  %s2001_s15 = sadd.s32 %s2217_s22, %s2216_s6  ;;  %p3937_p3 = scmp.ne.s32.totalorder %s3934_s12, 0 }
  0xd6   : > { %2665 = vrot.lane.b32.xlu1 %v2664_v19, %s2990_s4  ;;  %vm3445_vm3 = vmpackc.low %vm389_vm1, %vm389_vm1  ;;  %vm390_vm6 = vcmp.ne.s32.totalorder %v384_v43, 0  ;;  %vm392_vm9 = vcmp.ne.s32.totalorder %v386_v61, 0  ;;  %vm397_vm1 = vcmp.ne.s32.totalorder %v385_v37, 127  ;;  %s2218_s30 = sshll.u32 %s2001_s15, 7  ;;  %s3936_s5 = smov %s3935_s24 }
  0xd7   : > { %vm3472_vm7 = vmpackc.low %vm3451_vm4, %vm3451_vm4  ;;  %s3754_s14 = scalar_lea.hbm %s3935_s24, %s2218_s30 }
  0xd8   : > { %2660 = vrot.lane.b32.xlu0 %v2659_v21, %s2988_s29  ;;  %vm3483_vm8 = vmpackc.low %vm390_vm6, %vm390_vm6 }
  0xd9   : > { %vm3512_vm11 = vmpackc.low %vm392_vm9, %vm392_vm9  ;;  %vm398_vm9 = vcmp.ne.s32.totalorder %v386_v61, 127  ;;  %v1121_v61 = vld [vmem:[#allocation8 + $0x18] sm:$0xff] }
  0xda   : > { %2675 = vrot.lane.b32.xlu1 %v2674_v22, %s2990_s4  ;;  %vm3543_vm14 = vmpackc.low %vm395_vm13, %vm395_vm13 }
  0xdb   : > { %vm3564_vm4 = vmpackc.low %vm397_vm1, %vm397_vm1 }
  0xdc   : > { %2670 = vrot.lane.b32.xlu0 %v2669_v23, %s2990_s4  ;;  %vm3607_vm13 = vmpackc.low %vm398_vm9, %vm398_vm9 }
  0xde   : > { %2685 = vrot.lane.b32.xlu1 %v2684_v24, %s2990_s4 }
  0xe0   : > { %2680 = vrot.lane.b32.xlu0 %v2679_v25, %s2990_s4 }
  0xe2   : > { %2695 = vrot.lane.b32.xlu1 %v2694_v28, %s2988_s29  ;;  %s2817_s29 = scalar_lea.vmem %s3756_s7, 2048 }
  0xe3   : > { %p2818_p13 = scmp.ne.s32.totalorder %s3756_s7, %s2817_s29 }
  0xe4   : > { %2690 = vrot.lane.b32.xlu0 %v2694_v28, %s2990_s4  ;;  %s2991_s4 = smov [#allocation11]  }
  0xe5   : > { %p2819_p1 = pnand %p2818_p13, %p3937_p3  ;;  %s2821_s9 = sshll.u32 %s2991_s4, 4  ;;  %s2822_s9 = int_to_ptr.vmem [resolvable:$false] %s2821_s9 }
  0xe6   : > { %s2823_s2 = scalar_lea.vmem %s2822_s9, 4096  ;;  %p2824_p12 = scmp.lt.s32.totalorder %s3756_s7, %s2822_s9 }
  0xe7   : > { %p2820_p9 = pneg %p2819_p1  ;;  %p2825_p5 = scmp.lt.s32.totalorder %s2823_s2, %s2817_s29 }
  0xe9   : > { %p2826_p11 = por %p2825_p5, %p2824_p12 }
  0xeb   : > { %p2827_p7 = pnand %p2826_p11, %p2820_p9 }
 0x140   : > { %v2651_v36 = vpop.permute.xlu1 %2650 }
 0x141   : > { %v2653_v38 = vunpack.i.h.bf16 %v2651_v36  ;;  %v2652_v39 = vunpack.i.l.bf16 %v2651_v36 }
 0x142   : > { %v2641_v40 = vpop.permute.xlu0 %2640 }
 0x143   : > { %v2643_v41 = vunpack.i.h.bf16 %v2641_v40  ;;  %v2642_v42 = vunpack.i.l.bf16 %v2641_v40  ;;  %v460_v44 = vsel %vm436_vm0, 0.0, %v2652_v39  ;;  %v442_v45 = vsel %vm436_vm0, %v2652_v39, %v2653_v38  ;;  %v770_v40 = vld [vmem:[#allocation8 + $0x8] sm:$0xff] }
 0x144   : > { %v2656_v48 = vpop.permute.xlu1 %2655 }
 0x145   : > { %v459_v47 = vsel %vm436_vm0, 0.0, %v2642_v42  ;;  %v437_v49 = vsel %vm436_vm0, %v2642_v42, %v2643_v41  ;;  %v2658_v52 = vunpack.i.h.bf16 %v2656_v48  ;;  %v2657_v53 = vunpack.i.l.bf16 %v2656_v48 }
 0x146   : > { %v2646_v54 = vpop.permute.xlu0 %2645  ;;  %v3455_v55 = vpack.c.bf16 %v442_v45, %v437_v49  ;;  %v2290_v56 = vpack.c.bf16 %v460_v44, %v459_v47 }
 0x147   : > { %v2648_v57 = vunpack.i.h.bf16 %v2646_v54  ;;  %v2647_v58 = vunpack.i.l.bf16 %v2646_v54  ;;  %v443_v59 = vsel %vm436_vm0, %v2653_v38, %v2657_v53  ;;  %v444_v60 = vsel %vm436_vm0, %v2657_v53, %v2658_v52 }
 0x148   : > { %2289 = vmatprep.subr.msk.bf16.mxu0 %vm3445_vm3, %v3455_v55  ;;  %v3467_v0 = vpop.permute.xlu1 %2665 }
 0x149   : > { %v438_v62 = vsel %vm436_vm0, %v2643_v41, %v2647_v58  ;;  %v439_v63 = vsel %vm436_vm0, %v2647_v58, %v2648_v57  ;;  %2292 = vmatpush1.bf16.msk.msra.mxu0 %vm2291_vm5, %v2290_v56  ;;  %v2668_v16 = vunpack.i.h.bf16 %v3467_v0  ;;  %v2667_v19 = vunpack.i.l.bf16 %v3467_v0  ;;  %v954_v56 = vld [vmem:[#allocation8 + $0x10] sm:$0xff] }
 0x14a   : > { %v3476_v2 = vpack.c.bf16 %v444_v60, %v439_v63  ;;  %v3478_v3 = vpack.c.bf16 %v443_v59, %v438_v62  ;;  %v3480_v4 = vpop.permute.xlu0 %2660  ;;  %2294 = vmatprep.subr.bf16.mxu0 %v3395_v7  ;;  %vm396_vm5 = vcmp.ne.s32.totalorder %v384_v43, 127  ;;  %v381_v60 = vadd.s32 640, %v3421_v31 }
 0x14b   : > { %v2663_v6 = vunpack.i.h.bf16 %v3480_v4  ;;  %v2662_v8 = vunpack.i.l.bf16 %v3480_v4  ;;  %v523_v26 = vsel %vm521_vm12, %v2667_v19, %v2668_v16  ;;  %vm3583_vm6 = vmpackc.low %vm396_vm5, %vm396_vm5  ;;  %v583_v4 = vld [vmem:[%s3383_s26 + $0x8] sm:$0xff] }
 0x14c   : > { %2299 = vmatprep.subr.msk.bf16.mxu1 %vm3472_vm7, %v3476_v2  ;;  %v2676_v11 = vpop.permute.xlu1 %2675  ;;  %v387_v31 = vand.u32 127, %v381_v60  ;;  %v2194_v60 = vld [vmem:[%s3383_s26 + $0x58] sm:$0xff] }
 0x14d   : > { %v445_v9 = vsel %vm436_vm0, %v2658_v52, %v2663_v6  ;;  %v440_v10 = vsel %vm436_vm0, %v2648_v57, %v2662_v8  ;;  %2296 = vmatpush1.bf16.msra.mxu0 %v3409_v18  ;;  %2302 = vmatpush1.bf16.msk.msra.mxu1 %vm3483_vm8, %v3478_v3  ;;  %v2678_v21 = vunpack.i.h.bf16 %v2676_v11  ;;  %v2677_v22 = vunpack.i.l.bf16 %v2676_v11  ;;  %v584_v11 = vld [vmem:[%s3383_s26 + $0x10] sm:$0xff] }
 0x14e   : > { %v3504_v15 = vpop.permute.xlu0 %2670  ;;  %2309 = vmatprep.subr.msk.bf16.mxu0 %vm3483_vm8, %v3478_v3  ;;  %2304 = vmatprep.subr.bf16.mxu1 %v3400_v12  ;;  %v3516_v24 = vpack.c.bf16 %v445_v9, %v440_v10  ;;  %vm393_vm15 = vcmp.ne.s32.totalorder %v387_v31, 0 }
 0x14f   : > { %v528_v27 = vsel %vm521_vm12, %v2677_v22, %v2678_v21  ;;  %v2673_v38 = vunpack.i.h.bf16 %v3504_v15  ;;  %v2672_v42 = vunpack.i.l.bf16 %v3504_v15  ;;  %v585_v15 = vld [vmem:[%s3383_s26 + $0x18] sm:$0xff] }
 0x150   : > { %2175 = vmatmul.mubr.msk.f32.vlgmr.msra.gmra.mrb[0].mxu0 %vm603_vm10, %v602_v14  ;;  %v2686_v25 = vpop.permute.xlu1 %2685  ;;  %v3538_v41 = vpack.c.bf16 %v528_v27, %v523_v26 }
 0x151   : > { %2306 = vmatpush1.bf16.msra.mxu1 %v3402_v13  ;;  %2312 = vmatpush1.bf16.msk.msra.mxu0 %vm3445_vm3, %v3455_v55  ;;  %v2688_v28 = vunpack.i.h.bf16 %v2686_v25  ;;  %v2687_v30 = vunpack.i.l.bf16 %v2686_v25  ;;  %v525_v47 = vsel %vm521_vm12, %v2672_v42, %v2673_v38 }
 0x152   : > { %2319 = vmatprep.subr.msk.bf16.mxu1 %vm3512_vm11, %v3516_v24  ;;  %2314 = vmatprep.subr.bf16.mxu0 %v3402_v13  ;;  %v2681_v36 = vpop.permute.xlu0 %2680 }
 0x153   : > { %838 = vmatprep.mubr.f32.mxu0 %v2989_v20  ;;  %v2683_v39 = vunpack.i.h.bf16 %v2681_v36  ;;  %v2682_v32 = vunpack.i.l.bf16 %v2681_v36  ;;  %v527_v44 = vsel %vm521_vm12, %v2688_v28, %v2677_v22  ;;  %v522_v45 = vsel %vm521_vm12, %v2687_v30, %v2667_v19  ;;  %v2179_v30 = vld [vmem:[%s3383_s26 + $0x20] sm:$0xff]  ;;  %v2180_v36 = vld [vmem:[%s3383_s26 + $0x28] sm:$0xff] }
 0x154   : > { %2176 = vmatmul.mubr.msk.f32.vlgmr.msra.gmra.mrb[0].mxu1 %vm603_vm10, %v602_v14  ;;  %v2334_v51 = vpack.c.bf16 %v527_v44, %v522_v45  ;;  %v2696_v62 = vpop.permute.xlu1 %2695 }
 0x155   : > { %2316 = vmatpush1.bf16.msra.mxu0 %v3395_v7  ;;  %2322 = vmatpush1.bf16.msk.msra.mxu1 %vm3472_vm7, %v3476_v2  ;;  %v530_v48 = vsel %vm521_vm12, %v2682_v32, %v2683_v39  ;;  %v529_v37 = vsel %vm521_vm12, %v2678_v21, %v2682_v32  ;;  %v2698_v63 = vunpack.i.h.bf16 %v2696_v62  ;;  %v2697_v0 = vunpack.i.l.bf16 %v2696_v62 }
 0x156   : > { %2324 = vmatprep.subr.bf16.mxu1 %v3407_v17  ;;  %2328 = vmatprep.subr.bf16.mxu0 %v3395_v7  ;;  %v3558_v49 = vpop.permute.xlu0 %2690  ;;  %v3573_v52 = vpack.c.bf16 %v530_v48, %v525_v47 }
 0x157   : > { %909 = vmatprep.mubr.f32.mxu1 %v2989_v20  ;;  %v2693_v53 = vunpack.i.h.bf16 %v3558_v49  ;;  %v2692_v54 = vunpack.i.l.bf16 %v3558_v49  ;;  %v441_v9 = vsel %vm436_vm0, %v2662_v8, %v2697_v0  ;;  %v446_v50 = vsel %vm436_vm0, %v2663_v6, %v2698_v63 }
 0x158   : > { %2177 = vmatmul.mubr.msk.f32.vlgmr.msra.gmra.mrb[0].mxu0 %vm603_vm10, %v770_v40  ;;  %v2397_v8 = vpack.c.bf16 %v446_v50, %v441_v9  ;;  %vm399_vm0 = vcmp.ne.s32.totalorder %v387_v31, 127 }
 0x159   : > { %2326 = vmatpush1.bf16.msra.mxu1 %v3400_v12  ;;  %2330 = vmatpush1.bf16.msra.mxu0 %v3409_v18  ;;  %v524_v18 = vsel %vm521_vm12, %v2668_v16, %v2672_v42  ;;  %v526_v57 = vsel %vm521_vm12, %v2673_v38, %v2692_v54  ;;  %v531_v58 = vsel %vm521_vm12, %v2683_v39, %v2693_v53  ;;  %v2181_v42 = vld [vmem:[%s3383_s26 + $0x30] sm:$0xff] }
 0x15a   : > { %2333 = vmatprep.subr.msk.bf16.mxu0 %vm3543_vm14, %v3538_v41  ;;  %2338 = vmatprep.subr.bf16.mxu1 %v3400_v12  ;;  %v3587_v43 = vpack.c.bf16 %v529_v37, %v524_v18  ;;  %v3612_v59 = vpack.c.bf16 %v531_v58, %v526_v57 }
 0x15b   : > { %1022 = vmatprep.mubr.f32.mxu0 %v2989_v20 }
 0x15c   : > { %2178 = vmatmul.mubr.msk.f32.vlgmr.msra.gmra.mrb[0].mxu1 %vm603_vm10, %v770_v40 }
 0x15d   : > { %2336 = vmatpush1.bf16.msk.msra.mxu0 %vm2335_vm2, %v2334_v51  ;;  %2340 = vmatpush1.bf16.msra.mxu1 %v3402_v13 }
 0x15e   : > { %2343 = vmatprep.subr.msk.bf16.mxu1 %vm3564_vm4, %v3573_v52  ;;  %2348 = vmatprep.subr.bf16.mxu0 %v3402_v13 }
 0x15f   : > { %1093 = vmatprep.mubr.f32.mxu1 %v2989_v20 }
 0x160   : > { %2183 = vmatmul.mubr.msk.f32.vlgmr.msra.gmra.mrb[2].mxu0 %vm603_vm10, %v954_v56 }
 0x161   : > { %2346 = vmatpush1.bf16.msk.msra.mxu1 %vm3583_vm6, %v3587_v43  ;;  %2350 = vmatpush1.bf16.msra.mxu0 %v3395_v7 }
 0x162   : > { %2353 = vmatprep.subr.msk.bf16.mxu0 %vm3583_vm6, %v3587_v43  ;;  %2358 = vmatprep.subr.bf16.mxu1 %v3407_v17 }
 0x163   : > { %1189 = vmatprep.mubr.f32.mxu0 %v2989_v20 }
 0x164   : > { %2184 = vmatmul.mubr.msk.f32.vlgmr.msra.gmra.mrb[2].mxu1 %vm603_vm10, %v954_v56  ;;  %v2192_v56 = vld [vmem:[%s3383_s26 + $0x48] sm:$0xff] }
 0x165   : > { %2356 = vmatpush1.bf16.msk.msra.mxu0 %vm3543_vm14, %v3538_v41  ;;  %2360 = vmatpush1.bf16.msra.mxu1 %v3400_v12 }
 0x166   : > { %2363 = vmatprep.subr.msk.bf16.mxu1 %vm3607_vm13, %v3612_v59  ;;  %2369 = vmatprep.subr.msk.bf16.mxu0 %vm3483_vm8, %v3478_v3 }
 0x167   : > { %1260 = vmatprep.mubr.f32.mxu1 %v2989_v20 }
 0x168   : > { %2185 = vmatmul.mubr.msk.f32.vlgmr.msra.gmra.mrb[2].mxu0 %vm603_vm10, %v1121_v61 }
 0x169   : > { %2366 = vmatpush1.bf16.msk.msra.mxu1 %vm3564_vm4, %v3573_v52  ;;  %2372 = vmatpush1.bf16.msk.msra.mxu0 %vm3445_vm3, %v3455_v55  ;;  %v1306_v55 = vld [vmem:[#allocation8 + $0x20] sm:$0xff]  ;;  %vm2398_vm3 = vmpackc.low %vm393_vm15, %vm393_vm15 }
 0x16a   : > { %2379 = vmatprep.subr.msk.bf16.mxu1 %vm3512_vm11, %v3516_v24  ;;  %2374 = vmatprep.subr.bf16.mxu0 %v3402_v13 }
 0x16b   : > { %1374 = vmatprep.mubr.f32.mxu0 %v2989_v20 }
 0x16c   : > { %2186 = vmatmul.mubr.msk.f32.vlgmr.msra.gmra.mrb[2].mxu1 %vm603_vm10, %v1121_v61 }
 0x16d   : > { %2376 = vmatpush1.bf16.msra.mxu0 %v3395_v7  ;;  %2382 = vmatpush1.bf16.msk.msra.mxu1 %vm3472_vm7, %v3476_v2 }
 0x16e   : > { %2389 = vmatprep.subr.msk.bf16.mxu0 %vm3472_vm7, %v3476_v2  ;;  %2384 = vmatprep.subr.bf16.mxu1 %v3407_v17  ;;  %v1658_v2 = vld [vmem:[#allocation8 + $0x30] sm:$0xff]  ;;  %vm2442_vm7 = vmpackc.low %vm399_vm0, %vm399_vm0 }
 0x16f   : > { %1445 = vmatprep.mubr.f32.mxu1 %v2989_v20 }
 0x170   : > { %2195 = vmatmul.mubr.msk.f32.vlgmr.msra.gmra.mrb[4].mxu0 %vm603_vm10, %v1306_v55 }
 0x171   : > { %2386 = vmatpush1.bf16.msra.mxu1 %v3400_v12  ;;  %2392 = vmatpush1.bf16.msk.msra.mxu0 %vm3483_vm8, %v3478_v3  ;;  %v544_v3 = vsel %vm521_vm12, %v2692_v54, 0.0  ;;  %v2191_v54 = vld [vmem:[%s3383_s26 + $0x40] sm:$0xff] }
 0x172   : > { %2399 = vmatprep.subr.msk.bf16.mxu1 %vm2398_vm3, %v2397_v8  ;;  %2394 = vmatprep.subr.bf16.mxu0 %v3400_v12 }
 0x173   : > { %1541 = vmatprep.mubr.f32.mxu0 %v2989_v20 }
 0x174   : > { %2196 = vmatmul.mubr.msk.f32.vlgmr.msra.gmra.mrb[4].mxu1 %vm603_vm10, %v1306_v55 }
 0x175   : > { %2396 = vmatpush1.bf16.msra.mxu0 %v3402_v13  ;;  %2402 = vmatpush1.bf16.msk.msra.mxu1 %vm3512_vm11, %v3516_v24 }
 0x176   : > { %2404 = vmatprep.subr.bf16.mxu1 %v3419_v29  ;;  %2408 = vmatprep.subr.bf16.mxu0 %v3402_v13 }
 0x177   : > { %1612 = vmatprep.mubr.f32.mxu1 %v2989_v20 }
 0x178   : > { %2197 = vmatmul.mubr.msk.f32.vlgmr.msra.gmra.mrb[4].mxu0 %vm603_vm10, %v1473_v1 }
 0x179   : > { %2406 = vmatpush1.bf16.msra.mxu1 %v3407_v17  ;;  %2410 = vmatpush1.bf16.msra.mxu0 %v3395_v7  ;;  %v545_v7 = vsel %vm521_vm12, %v2693_v53, 0.0 }
 0x17a   : > { %2413 = vmatprep.subr.msk.bf16.mxu0 %vm3583_vm6, %v3587_v43  ;;  %2418 = vmatprep.subr.bf16.mxu1 %v3407_v17 }
 0x17b   : > { %1726 = vmatprep.mubr.f32.mxu0 %v2989_v20 }
 0x17c   : > { %2198 = vmatmul.mubr.msk.f32.vlgmr.msra.gmra.mrb[4].mxu1 %vm603_vm10, %v1473_v1 }
 0x17d   : > { %2416 = vmatpush1.bf16.msk.msra.mxu0 %vm3543_vm14, %v3538_v41  ;;  %2420 = vmatpush1.bf16.msra.mxu1 %v3400_v12 }
 0x17e   : > { %2423 = vmatprep.subr.msk.bf16.mxu1 %vm3607_vm13, %v3612_v59  ;;  %2428 = vmatprep.subr.bf16.mxu0 %v3400_v12  ;;  %v2441_v12 = vpack.c.bf16 %v545_v7, %v544_v3  ;;  %v2203_v7 = vld [vmem:[%s3383_s26 + $0x60] sm:$0xff]  ;;  %v2204_v3 = vld [vmem:[%s3383_s26 + $0x68] sm:$0xff] }
 0x17f   : > { %1797 = vmatprep.mubr.f32.mxu1 %v2989_v20 }
 0x180   : > { %2207 = vmatmul.mubr.msk.f32.vlgmr.msra.gmra.mrb[6].mxu0 %vm603_vm10, %v1658_v2 }
 0x181   : > { %2426 = vmatpush1.bf16.msk.msra.mxu1 %vm3564_vm4, %v3573_v52  ;;  %2430 = vmatpush1.bf16.msra.mxu0 %v3402_v13  ;;  %v1825_v13 = vld [vmem:[#allocation8 + $0x38] sm:$0xff] }
 0x182   : > { %2433 = vmatprep.subr.msk.bf16.mxu0 %vm3564_vm4, %v3573_v52  ;;  %2438 = vmatprep.subr.bf16.mxu1 %v3419_v29  ;;  %v582_v29 = vld [vmem:[%s3383_s26] sm:$0xff] }
 0x183   : > { %1893 = vmatprep.mubr.f32.mxu0 %v2989_v20 }
 0x184   : > { %2208 = vmatmul.mubr.msk.f32.vlgmr.msra.gmra.mrb[6].mxu1 %vm603_vm10, %v1658_v2 }
 0x185   : > { %2436 = vmatpush1.bf16.msk.msra.mxu0 %vm3583_vm6, %v3587_v43  ;;  %2440 = vmatpush1.bf16.msra.mxu1 %v3407_v17 }
 0x186   : > { %2443 = vmatprep.subr.msk.bf16.mxu1 %vm2442_vm7, %v2441_v12  ;;  %1964 = vmatprep.mubr.f32.mxu1 %v2989_v20 }
 0x188   : > { %2209 = vmatmul.mubr.msk.f32.vlgmr.msra.gmra.mrb[6].mxu0 %vm603_vm10, %v1825_v13 }
 0x189   : > { %2446 = vmatpush1.bf16.msk.msra.mxu1 %vm3607_vm13, %v3612_v59 }
 0x18c   : > { %2210 = vmatmul.mubr.msk.f32.vlgmr.msra.gmra.mrb[6].mxu1 %vm603_vm10, %v1825_v13 }
 0x22b   : > { %v840_v5 = vpop.f32.mrb[0].mxu0 }
 0x22c   : > { %v2447_v6 = vadd.f32 %v840_v5, %v582_v29  ;;  %v842_v10 = vpop.f32.mrb[1].mxu0  ;;  %v2205_v5 = vld [vmem:[%s3383_s26 + $0x70] sm:$0xff] }
 0x22d   : > { %v2448_v17 = vadd.f32 %v842_v10, %v583_v4  ;;  %v2206_v10 = vld [vmem:[%s3383_s26 + $0x78] sm:$0xff]  ;;  %s1989_s26 = scalar_lea.sflag [#allocation5], %s3360_s8 }
 0x22e   : > { %v920_v14 = vmul.f32 0.2, %v2447_v6 }
 0x22f   : > { %v921_v16 = vmul.f32 0.2, %v2448_v17  ;;  %v911_v20 = vpop.f32.mrb[0].mxu1 }
 0x230   : > { %v924_v19 = vmax.f32 %v2447_v6, %v920_v14  ;;  %v2449_v21 = vadd.f32 %v911_v20, %v584_v11  ;;  %v913_v22 = vpop.f32.mrb[1].mxu1 }
 0x231   : > { %v925_v23 = vmax.f32 %v2448_v17, %v921_v16  ;;  %v2450_v24 = vadd.f32 %v913_v22, %v585_v15 }
 0x232   : > { %928 = vst [vmem:[%s3720_s18] sm:$0xff] %v924_v19  ;;  %v922_v25 = vmul.f32 0.2, %v2449_v21 }
 0x233   : > { %929 = vst [vmem:[%s3720_s18 + $0x8] sm:$0xff] %v925_v23  ;;  %v923_v26 = vmul.f32 0.2, %v2450_v24 }
 0x234   : > { %v926_v27 = vmax.f32 %v2449_v21, %v922_v25 }
 0x235   : > { %v927_v28 = vmax.f32 %v2450_v24, %v923_v26 }
 0x236   : > { %930 = vst [vmem:[%s3720_s18 + $0x10] sm:$0xff] %v926_v27 }
 0x237   : > { %931 = vst [vmem:[%s3720_s18 + $0x18] sm:$0xff] %v927_v28 }
 0x23b   : > { %v1191_v38 = vpop.f32.mrb[2].mxu0 }
 0x23c   : > { %v2451_v39 = vadd.f32 %v2179_v30, %v1191_v38  ;;  %v1193_v40 = vpop.f32.mrb[3].mxu0 }
 0x23d   : > { %v2452_v41 = vadd.f32 %v2180_v36, %v1193_v40 }
 0x23e   : > { %v1271_v32 = vmul.f32 0.2, %v2451_v39 }
 0x23f   : > { %v1272_v44 = vmul.f32 0.2, %v2452_v41  ;;  %v1262_v45 = vpop.f32.mrb[2].mxu1 }
 0x240   : > { %v1275_v47 = vmax.f32 %v2451_v39, %v1271_v32  ;;  %v2453_v48 = vadd.f32 %v2181_v42, %v1262_v45  ;;  %v1264_v49 = vpop.f32.mrb[3].mxu1 }
 0x241   : > { %v1276_v51 = vmax.f32 %v2452_v41, %v1272_v44  ;;  %v2454_v33 = vadd.f32 %v2182_v34, %v1264_v49 }
 0x242   : > { %2187 = vst [vmem:[%s3720_s18 + $0x20] sm:$0xff] %v1275_v47  ;;  %v1273_v18 = vmul.f32 0.2, %v2453_v48 }
 0x243   : > { %2188 = vst [vmem:[%s3720_s18 + $0x28] sm:$0xff] %v1276_v51  ;;  %v1274_v37 = vmul.f32 0.2, %v2454_v33 }
 0x244   : > { %v1277_v52 = vmax.f32 %v2453_v48, %v1273_v18 }
 0x245   : > { %v1278_v53 = vmax.f32 %v2454_v33, %v1274_v37 }
 0x246   : > { %2189 = vst [vmem:[%s3720_s18 + $0x30] sm:$0xff] %v1277_v52 }
 0x247   : > { %2190 = vst [vmem:[%s3720_s18 + $0x38] sm:$0xff] %v1278_v53 }
 0x24b   : > { %v1543_v35 = vpop.f32.mrb[4].mxu0 }
 0x24c   : > { %v2455_v43 = vadd.f32 %v2191_v54, %v1543_v35  ;;  %v1545_v57 = vpop.f32.mrb[5].mxu0 }
 0x24d   : > { %v2456_v58 = vadd.f32 %v2192_v56, %v1545_v57 }
 0x24e   : > { %v1623_v59 = vmul.f32 0.2, %v2455_v43 }
 0x24f   : > { %v1624_v61 = vmul.f32 0.2, %v2456_v58  ;;  %v1614_v62 = vpop.f32.mrb[4].mxu1 }
 0x250   : > { %v1627_v31 = vmax.f32 %v2455_v43, %v1623_v59  ;;  %v2457_v63 = vadd.f32 %v2193_v46, %v1614_v62  ;;  %v1616_v0 = vpop.f32.mrb[5].mxu1 }
 0x251   : > { %v1628_v9 = vmax.f32 %v2456_v58, %v1624_v61  ;;  %v2458_v50 = vadd.f32 %v2194_v60, %v1616_v0 }
 0x252   : > { %2199 = vst [vmem:[%s3720_s18 + $0x40] sm:$0xff] %v1627_v31  ;;  %v1625_v55 = vmul.f32 0.2, %v2457_v63 }
 0x253   : > { %2200 = vst [vmem:[%s3720_s18 + $0x48] sm:$0xff] %v1628_v9  ;;  %v1626_v8 = vmul.f32 0.2, %v2458_v50 }
 0x254   : > { %v1629_v1 = vmax.f32 %v2457_v63, %v1625_v55 }
 0x255   : > { %v1630_v2 = vmax.f32 %v2458_v50, %v1626_v8 }
 0x256   : > { %2201 = vst [vmem:[%s3720_s18 + $0x50] sm:$0xff] %v1629_v1 }
 0x257   : > { %2202 = vst [vmem:[%s3720_s18 + $0x58] sm:$0xff] %v1630_v2 }
 0x25b   : > { %v1895_v12 = vpop.f32.mrb[6].mxu0 }
 0x25c   : > { %v2459_v13 = vadd.f32 %v2203_v7, %v1895_v12  ;;  %v1897_v29 = vpop.f32.mrb[7].mxu0 }
 0x25d   : > { %v2460_v4 = vadd.f32 %v2204_v3, %v1897_v29 }
 0x25e   : > { %v1975_v6 = vmul.f32 0.2, %v2459_v13 }
 0x25f   : > { %v1976_v17 = vmul.f32 0.2, %v2460_v4  ;;  %v1966_v11 = vpop.f32.mrb[6].mxu1 }
 0x260   : > { %v1979_v14 = vmax.f32 %v2459_v13, %v1975_v6  ;;  %v2461_v15 = vadd.f32 %v2205_v5, %v1966_v11  ;;  %v1968_v16 = vpop.f32.mrb[7].mxu1 }
 0x261   : > { %v1980_v20 = vmax.f32 %v2460_v4, %v1976_v17  ;;  %v2462_v19 = vadd.f32 %v2206_v10, %v1968_v16 }
 0x262   : > { %2211 = vst [vmem:[%s3720_s18 + $0x60] sm:$0xff] %v1979_v14  ;;  %v1977_v21 = vmul.f32 0.2, %v2461_v15 }
 0x263   : > { %2212 = vst [vmem:[%s3720_s18 + $0x68] sm:$0xff] %v1980_v20  ;;  %v1978_v22 = vmul.f32 0.2, %v2462_v19 }
 0x264   : > { %v1981_v23 = vmax.f32 %v2461_v15, %v1977_v21 }
 0x265   : > { %v1982_v24 = vmax.f32 %v2462_v19, %v1978_v22 }
 0x266   : > { %2213 = vst [vmem:[%s3720_s18 + $0x70] sm:$0xff] %v1981_v23 }
 0x267   : > { %2214 = vst [vmem:[%s3720_s18 + $0x78] sm:$0xff] %v1982_v24 }
 0x268   : > { %2830 = shalt.err (!%p2827_p7)
}
 0x269   : > { %s2831_s18 = scalar_lea.hbm %s3754_s14, 2048  ;;  %s2835_s22 = scalar_lea.hbm %s3936_s5, 16384 }
 0x26a   : > { %p2832_p10 = scmp.ne.s32.totalorder %s3754_s14, %s2831_s18  ;;  %p2836_p2 = scmp.lt.u32.totalorder %s3754_s14, %s3936_s5 }
 0x26b   : > { %p2837_p4 = scmp.lt.u32.totalorder %s2835_s22, %s2831_s18  ;;  %p2839_p13 = scmp.lt.u32.totalorder %s2831_s18, %s3754_s14 }
 0x26c   : > { %p2833_p0 = pnand %p2832_p10, %p3937_p3 }
 0x26d   : > { %p2838_p6 = por %p2837_p4, %p2836_p2 }
 0x26e   : > { %p2834_p8 = pneg %p2833_p0 }
 0x26f   : > { %p2840_p1 = por %p2839_p13, %p2838_p6 }
 0x271   : > { %p2841_p9 = pnand %p2840_p1, %p2834_p8 }
 0x273   : > { %2844 = shalt.err (!%p2841_p9)
}
 0x274   : > { %s2992_s11 = smov 512   ;;  %s2993_s13 = smov 2048  }
 0x275   : > { %s2994_s24 = smov 32  }
 0x276   : > { %2489 = dma.vmem_to_hbm [thread:$0]  (%p3937_p3), %s3756_s7, 2048, %s3754_s14, %s1989_s26, %s2992_s11, %s2993_s13, %s2994_s24  }
 0x277 PF: > { %s3938_s29 = sld [smem:[#allocation18_spill]]  ;;  %s3939_s4 = sld [smem:[#allocation25_spill]] }
 0x278   : > { %p2512_p12 = scmp.ge.s32.totalorder %s2975_s28, 2 }
 0x27d   : > { %s2019_s9 = sand.u32 1, %s3938_s29   ;;  %p3940_p5 = scmp.ne.s32.totalorder %s3939_s4, 0 }
 0x27e   : > { %s2020_s2 = scalar_lea.sflag [#allocation5], %s2019_s9 }
 0x27f   : > { %p2506_p11 = pnand %p2512_p12, %p3940_p5 }
 0x281   : > { %2918 = dma.done.wait (!%p2506_p11), %s2020_s2, 2048  }
 0x282   : > { %2920 = vsyncadd (!%p2506_p11), %s2020_s2, 4294965248  ;;  %s26_s28 = sadd.s32 1, %s2975_s28   ;;  %s3942_s8 = sld [smem:[#allocation17_spill]] }
 0x283   : > { %p3789_p7 = scmp.ge.s32.totalorder %s26_s28, 10   ;;  %s3943_s12 = sld [smem:[#allocation19_spill]] }
 0x284   : > { %s3944_s24 = sld [smem:[#allocation22_spill]]  ;;  %s3945_s26 = sld [smem:[#allocation26_spill]] }
 0x285   : > { %s3947_s15 = smov %s2927_s16  ;;  %s3948_s16 = smov %s2931_s17 }
 0x286   : > { %s3949_s17 = smov %s3299_s25  ;;  %s3951_s19 = smov %s2943_s20 }
 0x287   : > { %s3952_s20 = smov %s3247_s21  ;;  %s3954_s22 = smov %s2955_s23 }
 0x288   : > { %s3950_s18 = smov %s3942_s8  ;;  %s3955_s23 = smov %s3244_s0 }
 0x289   : > { %s3953_s21 = smov %s3943_s12  ;;  %s3956_s25 = smov %s2971_s27 }
 0x28a   : > { %s3957_s27 = smov %s3963_s10  ;;  %25 = sbr.rel (!%p3789_p7) target bundleno = 18 (0x12), region = 124 }
 0x291   :  { %2025 = vsyncpa [#allocation4], 1 }
 0x292   :  { %2027 = vsyncpa [#allocation4 + $0x1], 1 }
 0x293   :  { %2028 = vsyncpa [#allocation7], 1 }
 0x294   :  { %2030 = vsyncpa [#allocation7 + $0x1], 1 }
 0x295   :  { %2031 = vsyncpa [#allocation10], 1 }
 0x296   :  { %2033 = vsyncpa [#allocation10 + $0x1], 1 }
 0x297   :  { %2034 = vsyncpa [#allocation5], 1 }
 0x298   :  { %2036 = vsyncpa [#allocation5 + $0x1], 1 }

</bundles_post_ra>
